<compile_context>
chip_gen: v6e
topology: v6e:2x2x1
jax: 0.10.0
libtpu: 0.0.40
codegen_flags: <defaults>
</compile_context>

<pallas_src>
import math

import jax
import jax.numpy as jnp
from jax.experimental import pallas as pl
from jax.experimental.pallas import tpu as pltpu

# ----------------------------- config ---------------------------------------
N_USERS = 24
N_ITEMS = 40
N_NODES = N_USERS + N_ITEMS          # 64
EMB_DIM = 32
CONTEXT_HOPS = 2
N_LAYERS = CONTEXT_HOPS + 1          # hop-0 + propagated hops (stack depth)
BATCH = 4
K_NEGS = 2                           # == args_config.K ('rns' branch)
DECAY = 1e-4


# --------------------------- fused Pallas kernel ------------------------------
def ngcf_fused_kernel(users_ref, pos_ref, neg_ref,            # SMEM scalar prefetch
                      a_ref, ego0_ref, wcat_ref, bsum_ref,    # VMEM inputs
                      loss_ref, mf_ref, emb_ref,              # (1,1) outputs
                      pooled_ref):                            # VMEM scratch (N, D)
    a = a_ref[...]
    ego = ego0_ref[...]
    pooled = ego                                   # running sum for mean pooling

    for k in range(CONTEXT_HOPS):                  # static unroll; ego never leaves VMEM
        # side = A_hat @ ego     (one full-slab MXU push)
        side = jnp.dot(a, ego, preferred_element_type=jnp.float32)
        # merged matmul: [side | ego*side] @ [W_gc ; W_bi] + (b_gc + b_bi)
        lhs = jnp.concatenate([side, ego * side], axis=-1)          # (N, 2D)
        ego = jnp.dot(lhs, wcat_ref[k],
                      preferred_element_type=jnp.float32) + bsum_ref[k]
        # LeakyReLU(0.2)
        ego = jnp.maximum(ego, 0.2 * ego)
        # F.normalize(p=2, dim=1): rsqrt(EUP), clamp sumsq at 1e-24 == clamp norm at 1e-12
        inv = jax.lax.rsqrt(
            jnp.maximum(jnp.sum(ego * ego, axis=-1, keepdims=True), 1e-24))
        ego = ego * inv
        pooled = pooled + ego

    pooled_ref[...] = pooled * (1.0 / N_LAYERS)    # mean-pool over the L layers

    # ------------------------- fused BPR loss tail ---------------------------
    mf_acc = jnp.zeros((1, 1), jnp.float32)
    reg_acc = jnp.zeros((1, 1), jnp.float32)
    for b in range(BATCH):                         # static unroll (BATCH tiny)
        u_idx = users_ref[b]
        p_idx = pos_ref[b] + N_USERS
        u_row = pooled_ref[pl.ds(u_idx, 1), :]                       # (1, D)
        p_row = pooled_ref[pl.ds(p_idx, 1), :]
        pos_s = jnp.sum(u_row * p_row, axis=-1, keepdims=True)       # (1, 1)

        # hop-0 (raw) embeddings for the L2 regularizer (module uses layer 0)
        u0 = ego0_ref[pl.ds(u_idx, 1), :]
        p0 = ego0_ref[pl.ds(p_idx, 1), :]
        reg_acc = (reg_acc
                   + jnp.sum(u0 * u0, axis=-1, keepdims=True)
                   + jnp.sum(p0 * p0, axis=-1, keepdims=True))

        exp_sum = jnp.zeros((1, 1), jnp.float32)
        for kk in range(K_NEGS):
            n_idx = neg_ref[b, kk] + N_USERS
            n_row = pooled_ref[pl.ds(n_idx, 1), :]
            neg_s = jnp.sum(u_row * n_row, axis=-1, keepdims=True)
            # NOTE: exact module form log(1 + sum_k exp(neg - pos)); scores are
            # small at this scale (a logsumexp variant would be safer at scale).
            exp_sum = exp_sum + jnp.exp(neg_s - pos_s)
            n0 = ego0_ref[pl.ds(n_idx, 1), :]
            reg_acc = reg_acc + jnp.sum(n0 * n0, axis=-1, keepdims=True)
        mf_acc = mf_acc + jnp.log(1.0 + exp_sum)

    mf = mf_acc * (1.0 / BATCH)
    emb = reg_acc * (DECAY / (2.0 * BATCH))
    mf_ref[...] = mf
    emb_ref[...] = emb
    loss_ref[...] = mf + emb


# ----------------------------- wrapper ---------------------------------------
def ngcf_forward(a_norm, user_emb, item_emb, weights, users, pos_items, neg_items):
    """Mirrors NGCF.forward (ns='rns', dropout off) -> (loss, mf_loss, emb_loss)."""
    ego0 = jnp.concatenate([user_emb, item_emb], axis=0)              # (N, D)
    # pre-merge per-hop weights: W_cat = [W_gc ; W_bi]  (2D, D),  b_sum = b_gc + b_bi
    wcat = jnp.stack([jnp.concatenate([weights[f"W_gc_{k}"],
                                       weights[f"W_bi_{k}"]], axis=0)
                      for k in range(CONTEXT_HOPS)])                  # (H, 2D, D)
    bsum = jnp.stack([weights[f"b_gc_{k}"] + weights[f"b_bi_{k}"]
                      for k in range(CONTEXT_HOPS)])                  # (H, 1, D)

    n, d = ego0.shape
    scalar11 = jax.ShapeDtypeStruct((1, 1), jnp.float32)
    full2 = lambda i, *_: (0, 0)
    full3 = lambda i, *_: (0, 0, 0)

    loss, mf, emb = pl.pallas_call(
        ngcf_fused_kernel,
        out_shape=(scalar11, scalar11, scalar11),
        grid_spec=pltpu.PrefetchScalarGridSpec(
            num_scalar_prefetch=3,                 # users, pos_items, neg_items -> SMEM
            grid=(1,),                             # whole problem (~50 KiB) fits VMEM
            in_specs=[
                pl.BlockSpec((n, n), full2),                        # A_hat
                pl.BlockSpec((n, d), full2),                        # hop-0 embeddings
                pl.BlockSpec((CONTEXT_HOPS, 2 * d, d), full3),      # merged weights
                pl.BlockSpec((CONTEXT_HOPS, 1, d), full3),          # merged biases
            ],
            out_specs=(pl.BlockSpec((1, 1), full2),
                       pl.BlockSpec((1, 1), full2),
                       pl.BlockSpec((1, 1), full2)),
            scratch_shapes=[pltpu.VMEM((n, d), jnp.float32)],       # pooled embeddings
        ),
        compiler_params=pltpu.CompilerParams(
            dimension_semantics=("arbitrary",)),
    )(users, pos_items, neg_items[:, :K_NEGS], a_norm, ego0, wcat, bsum)
    return loss[0, 0], mf[0, 0], emb[0, 0]


# --------------------------- plain-JAX reference ------------------------------
def ngcf_reference(a_norm, user_emb, item_emb, weights, users, pos_items, neg_items):
    hi = jax.lax.Precision.HIGHEST
    ego = jnp.concatenate([user_emb, item_emb], axis=0)
    all_emb = [ego]
    for k in range(CONTEXT_HOPS):
        side = jnp.dot(a_norm, ego, precision=hi)
        sum_e = jnp.dot(side, weights[f"W_gc_{k}"], precision=hi) + weights[f"b_gc_{k}"]
        bi_e = jnp.dot(ego * side, weights[f"W_bi_{k}"], precision=hi) + weights[f"b_bi_{k}"]
        ego = jax.nn.leaky_relu(sum_e + bi_e, negative_slope=0.2)
        nrm = jnp.maximum(jnp.linalg.norm(ego, axis=1, keepdims=True), 1e-12)
        all_emb.append(ego / nrm)
    all_emb = jnp.stack(all_emb, axis=1)                     # (N, L, D)
    user_g, item_g = all_emb[:N_USERS], all_emb[N_USERS:]
    u_g = user_g[users]
    pos_g = item_g[pos_items]
    neg_g = item_g[neg_items[:, :K_NEGS]]
    u_e, pos_e, neg_e = u_g.mean(1), pos_g.mean(1), neg_g.mean(2)
    pos_scores = jnp.sum(u_e * pos_e, axis=1)
    neg_scores = jnp.sum(u_e[:, None, :] * neg_e, axis=-1)
    mf = jnp.mean(jnp.log(1.0 + jnp.sum(jnp.exp(neg_scores - pos_scores[:, None]), axis=1)))
    reg = (jnp.sum(u_g[:, 0, :] ** 2) + jnp.sum(pos_g[:, 0, :] ** 2)
           + jnp.sum(neg_g[:, :, 0, :] ** 2)) / 2.0
    emb = DECAY * reg / BATCH
    return mf + emb, mf, emb


# --------------------------- param / data setup ------------------------------
def xavier_uniform(key, shape):
    fan_out, fan_in = shape
    a = math.sqrt(6.0 / (fan_in + fan_out))
    return jax.random.uniform(key, shape, jnp.float32, -a, a)


def build_params(key):
    keys = jax.random.split(key, 2 + 4 * CONTEXT_HOPS)
    user_emb = xavier_uniform(keys[0], (N_USERS, EMB_DIM))
    item_emb = xavier_uniform(keys[1], (N_ITEMS, EMB_DIM))
    weights = {}
    idx = 2
    for k in range(CONTEXT_HOPS):
        weights[f"W_gc_{k}"] = xavier_uniform(keys[idx + 0], (EMB_DIM, EMB_DIM))
        weights[f"b_gc_{k}"] = xavier_uniform(keys[idx + 1], (1, EMB_DIM))
        weights[f"W_bi_{k}"] = xavier_uniform(keys[idx + 2], (EMB_DIM, EMB_DIM))
        weights[f"b_bi_{k}"] = xavier_uniform(keys[idx + 3], (1, EMB_DIM))
        idx += 4
    return user_emb, item_emb, weights


def build_norm_adj(key):
    # synthetic bipartite interactions, symmetrically normalized (dense)
    r = (jax.random.uniform(key, (N_USERS, N_ITEMS)) < 0.2).astype(jnp.float32)
    a = jnp.zeros((N_NODES, N_NODES), jnp.float32)
    a = a.at[:N_USERS, N_USERS:].set(r)
    a = a.at[N_USERS:, :N_USERS].set(r.T)
    deg = jnp.sum(a, axis=1)
    d_inv_sqrt = jnp.where(deg > 0, 1.0 / jnp.sqrt(jnp.maximum(deg, 1e-12)), 0.0)
    return d_inv_sqrt[:, None] * a * d_inv_sqrt[None, :]


# --------------------------------- main --------------------------------------
if __name__ == "__main__":
    root = jax.random.PRNGKey(0)
    k_param, k_adj, k_u, k_p, k_n = jax.random.split(root, 5)

    user_emb, item_emb, weights = build_params(k_param)
    a_norm = build_norm_adj(k_adj)

    users = jax.random.randint(k_u, (BATCH,), 0, N_USERS, dtype=jnp.int32)
    pos_items = jax.random.randint(k_p, (BATCH,), 0, N_ITEMS, dtype=jnp.int32)
    neg_items = jax.random.randint(k_n, (BATCH, K_NEGS), 0, N_ITEMS, dtype=jnp.int32)

    fwd = jax.jit(ngcf_forward)
    loss, mf_loss, emb_loss = fwd(a_norm, user_emb, item_emb, weights,
                                  users, pos_items, neg_items)
    jax.block_until_ready((loss, mf_loss, emb_loss))

    ref_loss, ref_mf, ref_emb = jax.jit(ngcf_reference)(
        a_norm, user_emb, item_emb, weights, users, pos_items, neg_items)
    jax.block_until_ready((ref_loss, ref_mf, ref_emb))

    assert jnp.isfinite(loss) and jnp.isfinite(mf_loss) and jnp.isfinite(emb_loss)
    assert jnp.allclose(loss, ref_loss, rtol=2e-2, atol=1e-3), (loss, ref_loss)
    assert jnp.allclose(mf_loss, ref_mf, rtol=2e-2, atol=1e-3), (mf_loss, ref_mf)
    assert jnp.allclose(emb_loss, ref_emb, rtol=2e-2, atol=1e-6), (emb_loss, ref_emb)
    print("KERNEL_OK")
</pallas_src>

<mosaic_0001>
module attributes {stable_mosaic.version = 11 : i64} {
  func.func @ngcf_fused_kernel(%arg0: i32, %arg1: memref<4xi32, #tpu.memory_space<smem>>, %arg2: memref<4xi32, #tpu.memory_space<smem>>, %arg3: memref<4x2xi32, #tpu.memory_space<smem>>, %arg4: memref<64x64xf32, #tpu.memory_space<vmem>>, %arg5: memref<64x32xf32, #tpu.memory_space<vmem>>, %arg6: memref<2x64x32xf32, #tpu.memory_space<vmem>>, %arg7: memref<2x1x32xf32, #tpu.memory_space<vmem>>, %arg8: memref<1x1xf32, #tpu.memory_space<vmem>>, %arg9: memref<1x1xf32, #tpu.memory_space<vmem>>, %arg10: memref<1x1xf32, #tpu.memory_space<vmem>>, %arg11: memref<64x32xf32, #tpu.memory_space<vmem>>) attributes {dimension_semantics = [#tpu.dimension_semantics<arbitrary>], iteration_bounds = array<i64: 1>, scalar_prefetch = 3 : i64, scratch_operands = 1 : i64, tpu.core_type = #tpu.core_type<tc>, window_params = [{pipeline_mode = #tpu.pipeline_mode<synchronous>, transform_indices = @transform_0, window_bounds = array<i64: 64, 64>}, {pipeline_mode = #tpu.pipeline_mode<synchronous>, transform_indices = @transform_1, window_bounds = array<i64: 64, 32>}, {pipeline_mode = #tpu.pipeline_mode<synchronous>, transform_indices = @transform_2, window_bounds = array<i64: 2, 64, 32>}, {pipeline_mode = #tpu.pipeline_mode<synchronous>, transform_indices = @transform_3, window_bounds = array<i64: 2, 1, 32>}, {pipeline_mode = #tpu.pipeline_mode<synchronous>, transform_indices = @transform_4, window_bounds = array<i64: 1, 1>}, {pipeline_mode = #tpu.pipeline_mode<synchronous>, transform_indices = @transform_5, window_bounds = array<i64: 1, 1>}, {pipeline_mode = #tpu.pipeline_mode<synchronous>, transform_indices = @transform_6, window_bounds = array<i64: 1, 1>}]} {
    %c0 = arith.constant 0 : index
    %c0_0 = arith.constant 0 : index
    %0 = vector.load %arg4[%c0, %c0_0] : memref<64x64xf32, #tpu.memory_space<vmem>>, vector<64x64xf32>
    %c0_1 = arith.constant 0 : index
    %c0_2 = arith.constant 0 : index
    %1 = vector.load %arg5[%c0_1, %c0_2] : memref<64x32xf32, #tpu.memory_space<vmem>>, vector<64x32xf32>
    %cst = arith.constant dense<0.000000e+00> : vector<64x32xf32>
    %2 = tpu.matmul %0, %1, %cst {dimension_numbers = #tpu.dot_dimension_numbers<[1], [0], [0], [1], [0, 0, 1, 1], [], []>} : vector<64x64xf32>, vector<64x32xf32>, vector<64x32xf32> -> vector<64x32xf32>
    %3 = arith.mulf %1, %2 : vector<64x32xf32>
    %4 = tpu.concatenate %2, %3 in 1 : vector<64x32xf32>, vector<64x32xf32> -> vector<64x64xf32>
    %c0_3 = arith.constant 0 : index
    %c0_4 = arith.constant 0 : index
    %c0_5 = arith.constant 0 : index
    %5 = vector.load %arg6[%c0_3, %c0_4, %c0_5] : memref<2x64x32xf32, #tpu.memory_space<vmem>>, vector<1x64x32xf32>
    %6 = vector.shape_cast %5 : vector<1x64x32xf32> to vector<64x32xf32>
    %cst_6 = arith.constant dense<0.000000e+00> : vector<64x32xf32>
    %7 = tpu.matmul %4, %6, %cst_6 {dimension_numbers = #tpu.dot_dimension_numbers<[1], [0], [0], [1], [0, 0, 1, 1], [], []>} : vector<64x64xf32>, vector<64x32xf32>, vector<64x32xf32> -> vector<64x32xf32>
    %c0_7 = arith.constant 0 : index
    %c0_8 = arith.constant 0 : index
    %c0_9 = arith.constant 0 : index
    %8 = vector.load %arg7[%c0_7, %c0_8, %c0_9] : memref<2x1x32xf32, #tpu.memory_space<vmem>>, vector<1x1x32xf32>
    %9 = vector.shape_cast %8 : vector<1x1x32xf32> to vector<1x32xf32>
    %10 = vector.broadcast %9 : vector<1x32xf32> to vector<64x32xf32>
    %11 = arith.addf %7, %10 : vector<64x32xf32>
    %cst_10 = arith.constant 2.000000e-01 : f32
    %12 = vector.broadcast %cst_10 : f32 to vector<64x32xf32>
    %13 = arith.mulf %12, %11 : vector<64x32xf32>
    %14 = arith.maximumf %11, %13 : vector<64x32xf32>
    %15 = arith.mulf %14, %14 : vector<64x32xf32>
    %cst_11 = arith.constant dense<0.000000e+00> : vector<64xf32>
    %16 = vector.multi_reduction <add>, %15, %cst_11 [1] : vector<64x32xf32> to vector<64xf32>
    %17 = vector.shape_cast %16 : vector<64xf32> to vector<64x1xf32>
    %cst_12 = arith.constant 1.000000e-24 : f32
    %18 = vector.broadcast %cst_12 : f32 to vector<64x1xf32>
    %19 = arith.maximumf %17, %18 : vector<64x1xf32>
    %20 = math.rsqrt %19 : vector<64x1xf32>
    %21 = vector.broadcast %20 : vector<64x1xf32> to vector<64x32xf32>
    %22 = arith.mulf %14, %21 : vector<64x32xf32>
    %23 = arith.addf %1, %22 : vector<64x32xf32>
    %cst_13 = arith.constant dense<0.000000e+00> : vector<64x32xf32>
    %24 = tpu.matmul %0, %22, %cst_13 {dimension_numbers = #tpu.dot_dimension_numbers<[1], [0], [0], [1], [0, 0, 1, 1], [], []>} : vector<64x64xf32>, vector<64x32xf32>, vector<64x32xf32> -> vector<64x32xf32>
    %25 = arith.mulf %22, %24 : vector<64x32xf32>
    %26 = tpu.concatenate %24, %25 in 1 : vector<64x32xf32>, vector<64x32xf32> -> vector<64x64xf32>
    %c1 = arith.constant 1 : index
    %c0_14 = arith.constant 0 : index
    %c0_15 = arith.constant 0 : index
    %27 = vector.load %arg6[%c1, %c0_14, %c0_15] : memref<2x64x32xf32, #tpu.memory_space<vmem>>, vector<1x64x32xf32>
    %28 = vector.shape_cast %27 : vector<1x64x32xf32> to vector<64x32xf32>
    %cst_16 = arith.constant dense<0.000000e+00> : vector<64x32xf32>
    %29 = tpu.matmul %26, %28, %cst_16 {dimension_numbers = #tpu.dot_dimension_numbers<[1], [0], [0], [1], [0, 0, 1, 1], [], []>} : vector<64x64xf32>, vector<64x32xf32>, vector<64x32xf32> -> vector<64x32xf32>
    %c1_17 = arith.constant 1 : index
    %c0_18 = arith.constant 0 : index
    %c0_19 = arith.constant 0 : index
    %30 = vector.load %arg7[%c1_17, %c0_18, %c0_19] : memref<2x1x32xf32, #tpu.memory_space<vmem>>, vector<1x1x32xf32>
    %31 = vector.shape_cast %30 : vector<1x1x32xf32> to vector<1x32xf32>
    %32 = vector.broadcast %31 : vector<1x32xf32> to vector<64x32xf32>
    %33 = arith.addf %29, %32 : vector<64x32xf32>
    %cst_20 = arith.constant 2.000000e-01 : f32
    %34 = vector.broadcast %cst_20 : f32 to vector<64x32xf32>
    %35 = arith.mulf %34, %33 : vector<64x32xf32>
    %36 = arith.maximumf %33, %35 : vector<64x32xf32>
    %37 = arith.mulf %36, %36 : vector<64x32xf32>
    %cst_21 = arith.constant dense<0.000000e+00> : vector<64xf32>
    %38 = vector.multi_reduction <add>, %37, %cst_21 [1] : vector<64x32xf32> to vector<64xf32>
    %39 = vector.shape_cast %38 : vector<64xf32> to vector<64x1xf32>
    %cst_22 = arith.constant 1.000000e-24 : f32
    %40 = vector.broadcast %cst_22 : f32 to vector<64x1xf32>
    %41 = arith.maximumf %39, %40 : vector<64x1xf32>
    %42 = math.rsqrt %41 : vector<64x1xf32>
    %43 = vector.broadcast %42 : vector<64x1xf32> to vector<64x32xf32>
    %44 = arith.mulf %36, %43 : vector<64x32xf32>
    %45 = arith.addf %23, %44 : vector<64x32xf32>
    %cst_23 = arith.constant 0.333333343 : f32
    %46 = vector.broadcast %cst_23 : f32 to vector<64x32xf32>
    %47 = arith.mulf %45, %46 : vector<64x32xf32>
    %c0_24 = arith.constant 0 : index
    %c0_25 = arith.constant 0 : index
    %48 = vector.load %arg11[%c0_24, %c0_25] : memref<64x32xf32, #tpu.memory_space<vmem>>, vector<64x32xf32>
    tpu.vector_store %arg11[%c0_24, %c0_25], %47 {strides = array<i32>} : memref<64x32xf32, #tpu.memory_space<vmem>>, vector<64x32xf32>,
    %cst_26 = arith.constant 0.000000e+00 : f32
    %49 = vector.broadcast %cst_26 : f32 to vector<1x1xf32>
    %cst_27 = arith.constant 0.000000e+00 : f32
    %50 = vector.broadcast %cst_27 : f32 to vector<1x1xf32>
    %c0_28 = arith.constant 0 : index
    %51 = memref.load %arg1[%c0_28] : memref<4xi32, #tpu.memory_space<smem>>
    %c0_29 = arith.constant 0 : index
    %52 = memref.load %arg2[%c0_29] : memref<4xi32, #tpu.memory_space<smem>>
    %c24_i32 = arith.constant 24 : i32
    %53 = arith.addi %52, %c24_i32 : i32
    %54 = arith.index_cast %51 : i32 to index
    %c0_30 = arith.constant 0 : index
    %55 = vector.load %arg11[%54, %c0_30] : memref<64x32xf32, #tpu.memory_space<vmem>>, vector<1x32xf32>
    %56 = arith.index_cast %53 : i32 to index
    %c0_31 = arith.constant 0 : index
    %57 = vector.load %arg11[%56, %c0_31] : memref<64x32xf32, #tpu.memory_space<vmem>>, vector<1x32xf32>
    %58 = arith.mulf %55, %57 : vector<1x32xf32>
    %cst_32 = arith.constant dense<0.000000e+00> : vector<1xf32>
    %59 = vector.multi_reduction <add>, %58, %cst_32 [1] : vector<1x32xf32> to vector<1xf32>
    %60 = vector.shape_cast %59 : vector<1xf32> to vector<1x1xf32>
    %61 = arith.index_cast %51 : i32 to index
    %c0_33 = arith.constant 0 : index
    %62 = vector.load %arg5[%61, %c0_33] : memref<64x32xf32, #tpu.memory_space<vmem>>, vector<1x32xf32>
    %63 = arith.index_cast %53 : i32 to index
    %c0_34 = arith.constant 0 : index
    %64 = vector.load %arg5[%63, %c0_34] : memref<64x32xf32, #tpu.memory_space<vmem>>, vector<1x32xf32>
    %65 = arith.mulf %62, %62 : vector<1x32xf32>
    %cst_35 = arith.constant dense<0.000000e+00> : vector<1xf32>
    %66 = vector.multi_reduction <add>, %65, %cst_35 [1] : vector<1x32xf32> to vector<1xf32>
    %67 = vector.shape_cast %66 : vector<1xf32> to vector<1x1xf32>
    %68 = arith.addf %50, %67 : vector<1x1xf32>
    %69 = arith.mulf %64, %64 : vector<1x32xf32>
    %cst_36 = arith.constant dense<0.000000e+00> : vector<1xf32>
    %70 = vector.multi_reduction <add>, %69, %cst_36 [1] : vector<1x32xf32> to vector<1xf32>
    %71 = vector.shape_cast %70 : vector<1xf32> to vector<1x1xf32>
    %72 = arith.addf %68, %71 : vector<1x1xf32>
    %cst_37 = arith.constant 0.000000e+00 : f32
    %73 = vector.broadcast %cst_37 : f32 to vector<1x1xf32>
    %c0_38 = arith.constant 0 : index
    %c0_39 = arith.constant 0 : index
    %74 = memref.load %arg3[%c0_38, %c0_39] : memref<4x2xi32, #tpu.memory_space<smem>>
    %c24_i32_40 = arith.constant 24 : i32
    %75 = arith.addi %74, %c24_i32_40 : i32
    %76 = arith.index_cast %75 : i32 to index
    %c0_41 = arith.constant 0 : index
    %77 = vector.load %arg11[%76, %c0_41] : memref<64x32xf32, #tpu.memory_space<vmem>>, vector<1x32xf32>
    %78 = arith.mulf %55, %77 : vector<1x32xf32>
    %cst_42 = arith.constant dense<0.000000e+00> : vector<1xf32>
    %79 = vector.multi_reduction <add>, %78, %cst_42 [1] : vector<1x32xf32> to vector<1xf32>
    %80 = vector.shape_cast %79 : vector<1xf32> to vector<1x1xf32>
    %81 = arith.subf %80, %60 : vector<1x1xf32>
    %82 = math.exp %81 : vector<1x1xf32>
    %83 = arith.addf %73, %82 : vector<1x1xf32>
    %84 = arith.index_cast %75 : i32 to index
    %c0_43 = arith.constant 0 : index
    %85 = vector.load %arg5[%84, %c0_43] : memref<64x32xf32, #tpu.memory_space<vmem>>, vector<1x32xf32>
    %86 = arith.mulf %85, %85 : vector<1x32xf32>
    %cst_44 = arith.constant dense<0.000000e+00> : vector<1xf32>
    %87 = vector.multi_reduction <add>, %86, %cst_44 [1] : vector<1x32xf32> to vector<1xf32>
    %88 = vector.shape_cast %87 : vector<1xf32> to vector<1x1xf32>
    %89 = arith.addf %72, %88 : vector<1x1xf32>
    %c0_45 = arith.constant 0 : index
    %c1_46 = arith.constant 1 : index
    %90 = memref.load %arg3[%c0_45, %c1_46] : memref<4x2xi32, #tpu.memory_space<smem>>
    %c24_i32_47 = arith.constant 24 : i32
    %91 = arith.addi %90, %c24_i32_47 : i32
    %92 = arith.index_cast %91 : i32 to index
    %c0_48 = arith.constant 0 : index
    %93 = vector.load %arg11[%92, %c0_48] : memref<64x32xf32, #tpu.memory_space<vmem>>, vector<1x32xf32>
    %94 = arith.mulf %55, %93 : vector<1x32xf32>
    %cst_49 = arith.constant dense<0.000000e+00> : vector<1xf32>
    %95 = vector.multi_reduction <add>, %94, %cst_49 [1] : vector<1x32xf32> to vector<1xf32>
    %96 = vector.shape_cast %95 : vector<1xf32> to vector<1x1xf32>
    %97 = arith.subf %96, %60 : vector<1x1xf32>
    %98 = math.exp %97 : vector<1x1xf32>
    %99 = arith.addf %83, %98 : vector<1x1xf32>
    %100 = arith.index_cast %91 : i32 to index
    %c0_50 = arith.constant 0 : index
    %101 = vector.load %arg5[%100, %c0_50] : memref<64x32xf32, #tpu.memory_space<vmem>>, vector<1x32xf32>
    %102 = arith.mulf %101, %101 : vector<1x32xf32>
    %cst_51 = arith.constant dense<0.000000e+00> : vector<1xf32>
    %103 = vector.multi_reduction <add>, %102, %cst_51 [1] : vector<1x32xf32> to vector<1xf32>
    %104 = vector.shape_cast %103 : vector<1xf32> to vector<1x1xf32>
    %105 = arith.addf %89, %104 : vector<1x1xf32>
    %cst_52 = arith.constant 1.000000e+00 : f32
    %106 = vector.broadcast %cst_52 : f32 to vector<1x1xf32>
    %107 = arith.addf %106, %99 : vector<1x1xf32>
    %108 = math.log %107 : vector<1x1xf32>
    %109 = arith.addf %49, %108 : vector<1x1xf32>
    %c1_53 = arith.constant 1 : index
    %110 = memref.load %arg1[%c1_53] : memref<4xi32, #tpu.memory_space<smem>>
    %c1_54 = arith.constant 1 : index
    %111 = memref.load %arg2[%c1_54] : memref<4xi32, #tpu.memory_space<smem>>
    %c24_i32_55 = arith.constant 24 : i32
    %112 = arith.addi %111, %c24_i32_55 : i32
    %113 = arith.index_cast %110 : i32 to index
    %c0_56 = arith.constant 0 : index
    %114 = vector.load %arg11[%113, %c0_56] : memref<64x32xf32, #tpu.memory_space<vmem>>, vector<1x32xf32>
    %115 = arith.index_cast %112 : i32 to index
    %c0_57 = arith.constant 0 : index
    %116 = vector.load %arg11[%115, %c0_57] : memref<64x32xf32, #tpu.memory_space<vmem>>, vector<1x32xf32>
    %117 = arith.mulf %114, %116 : vector<1x32xf32>
    %cst_58 = arith.constant dense<0.000000e+00> : vector<1xf32>
    %118 = vector.multi_reduction <add>, %117, %cst_58 [1] : vector<1x32xf32> to vector<1xf32>
    %119 = vector.shape_cast %118 : vector<1xf32> to vector<1x1xf32>
    %120 = arith.index_cast %110 : i32 to index
    %c0_59 = arith.constant 0 : index
    %121 = vector.load %arg5[%120, %c0_59] : memref<64x32xf32, #tpu.memory_space<vmem>>, vector<1x32xf32>
    %122 = arith.index_cast %112 : i32 to index
    %c0_60 = arith.constant 0 : index
    %123 = vector.load %arg5[%122, %c0_60] : memref<64x32xf32, #tpu.memory_space<vmem>>, vector<1x32xf32>
    %124 = arith.mulf %121, %121 : vector<1x32xf32>
    %cst_61 = arith.constant dense<0.000000e+00> : vector<1xf32>
    %125 = vector.multi_reduction <add>, %124, %cst_61 [1] : vector<1x32xf32> to vector<1xf32>
    %126 = vector.shape_cast %125 : vector<1xf32> to vector<1x1xf32>
    %127 = arith.addf %105, %126 : vector<1x1xf32>
    %128 = arith.mulf %123, %123 : vector<1x32xf32>
    %cst_62 = arith.constant dense<0.000000e+00> : vector<1xf32>
    %129 = vector.multi_reduction <add>, %128, %cst_62 [1] : vector<1x32xf32> to vector<1xf32>
    %130 = vector.shape_cast %129 : vector<1xf32> to vector<1x1xf32>
    %131 = arith.addf %127, %130 : vector<1x1xf32>
    %cst_63 = arith.constant 0.000000e+00 : f32
    %132 = vector.broadcast %cst_63 : f32 to vector<1x1xf32>
    %c1_64 = arith.constant 1 : index
    %c0_65 = arith.constant 0 : index
    %133 = memref.load %arg3[%c1_64, %c0_65] : memref<4x2xi32, #tpu.memory_space<smem>>
    %c24_i32_66 = arith.constant 24 : i32
    %134 = arith.addi %133, %c24_i32_66 : i32
    %135 = arith.index_cast %134 : i32 to index
    %c0_67 = arith.constant 0 : index
    %136 = vector.load %arg11[%135, %c0_67] : memref<64x32xf32, #tpu.memory_space<vmem>>, vector<1x32xf32>
    %137 = arith.mulf %114, %136 : vector<1x32xf32>
    %cst_68 = arith.constant dense<0.000000e+00> : vector<1xf32>
    %138 = vector.multi_reduction <add>, %137, %cst_68 [1] : vector<1x32xf32> to vector<1xf32>
    %139 = vector.shape_cast %138 : vector<1xf32> to vector<1x1xf32>
    %140 = arith.subf %139, %119 : vector<1x1xf32>
    %141 = math.exp %140 : vector<1x1xf32>
    %142 = arith.addf %132, %141 : vector<1x1xf32>
    %143 = arith.index_cast %134 : i32 to index
    %c0_69 = arith.constant 0 : index
    %144 = vector.load %arg5[%143, %c0_69] : memref<64x32xf32, #tpu.memory_space<vmem>>, vector<1x32xf32>
    %145 = arith.mulf %144, %144 : vector<1x32xf32>
    %cst_70 = arith.constant dense<0.000000e+00> : vector<1xf32>
    %146 = vector.multi_reduction <add>, %145, %cst_70 [1] : vector<1x32xf32> to vector<1xf32>
    %147 = vector.shape_cast %146 : vector<1xf32> to vector<1x1xf32>
    %148 = arith.addf %131, %147 : vector<1x1xf32>
    %c1_71 = arith.constant 1 : index
    %c1_72 = arith.constant 1 : index
    %149 = memref.load %arg3[%c1_71, %c1_72] : memref<4x2xi32, #tpu.memory_space<smem>>
    %c24_i32_73 = arith.constant 24 : i32
    %150 = arith.addi %149, %c24_i32_73 : i32
    %151 = arith.index_cast %150 : i32 to index
    %c0_74 = arith.constant 0 : index
    %152 = vector.load %arg11[%151, %c0_74] : memref<64x32xf32, #tpu.memory_space<vmem>>, vector<1x32xf32>
    %153 = arith.mulf %114, %152 : vector<1x32xf32>
    %cst_75 = arith.constant dense<0.000000e+00> : vector<1xf32>
    %154 = vector.multi_reduction <add>, %153, %cst_75 [1] : vector<1x32xf32> to vector<1xf32>
    %155 = vector.shape_cast %154 : vector<1xf32> to vector<1x1xf32>
    %156 = arith.subf %155, %119 : vector<1x1xf32>
    %157 = math.exp %156 : vector<1x1xf32>
    %158 = arith.addf %142, %157 : vector<1x1xf32>
    %159 = arith.index_cast %150 : i32 to index
    %c0_76 = arith.constant 0 : index
    %160 = vector.load %arg5[%159, %c0_76] : memref<64x32xf32, #tpu.memory_space<vmem>>, vector<1x32xf32>
    %161 = arith.mulf %160, %160 : vector<1x32xf32>
    %cst_77 = arith.constant dense<0.000000e+00> : vector<1xf32>
    %162 = vector.multi_reduction <add>, %161, %cst_77 [1] : vector<1x32xf32> to vector<1xf32>
    %163 = vector.shape_cast %162 : vector<1xf32> to vector<1x1xf32>
    %164 = arith.addf %148, %163 : vector<1x1xf32>
    %cst_78 = arith.constant 1.000000e+00 : f32
    %165 = vector.broadcast %cst_78 : f32 to vector<1x1xf32>
    %166 = arith.addf %165, %158 : vector<1x1xf32>
    %167 = math.log %166 : vector<1x1xf32>
    %168 = arith.addf %109, %167 : vector<1x1xf32>
    %c2 = arith.constant 2 : index
    %169 = memref.load %arg1[%c2] : memref<4xi32, #tpu.memory_space<smem>>
    %c2_79 = arith.constant 2 : index
    %170 = memref.load %arg2[%c2_79] : memref<4xi32, #tpu.memory_space<smem>>
    %c24_i32_80 = arith.constant 24 : i32
    %171 = arith.addi %170, %c24_i32_80 : i32
    %172 = arith.index_cast %169 : i32 to index
    %c0_81 = arith.constant 0 : index
    %173 = vector.load %arg11[%172, %c0_81] : memref<64x32xf32, #tpu.memory_space<vmem>>, vector<1x32xf32>
    %174 = arith.index_cast %171 : i32 to index
    %c0_82 = arith.constant 0 : index
    %175 = vector.load %arg11[%174, %c0_82] : memref<64x32xf32, #tpu.memory_space<vmem>>, vector<1x32xf32>
    %176 = arith.mulf %173, %175 : vector<1x32xf32>
    %cst_83 = arith.constant dense<0.000000e+00> : vector<1xf32>
    %177 = vector.multi_reduction <add>, %176, %cst_83 [1] : vector<1x32xf32> to vector<1xf32>
    %178 = vector.shape_cast %177 : vector<1xf32> to vector<1x1xf32>
    %179 = arith.index_cast %169 : i32 to index
    %c0_84 = arith.constant 0 : index
    %180 = vector.load %arg5[%179, %c0_84] : memref<64x32xf32, #tpu.memory_space<vmem>>, vector<1x32xf32>
    %181 = arith.index_cast %171 : i32 to index
    %c0_85 = arith.constant 0 : index
    %182 = vector.load %arg5[%181, %c0_85] : memref<64x32xf32, #tpu.memory_space<vmem>>, vector<1x32xf32>
    %183 = arith.mulf %180, %180 : vector<1x32xf32>
    %cst_86 = arith.constant dense<0.000000e+00> : vector<1xf32>
    %184 = vector.multi_reduction <add>, %183, %cst_86 [1] : vector<1x32xf32> to vector<1xf32>
    %185 = vector.shape_cast %184 : vector<1xf32> to vector<1x1xf32>
    %186 = arith.addf %164, %185 : vector<1x1xf32>
    %187 = arith.mulf %182, %182 : vector<1x32xf32>
    %cst_87 = arith.constant dense<0.000000e+00> : vector<1xf32>
    %188 = vector.multi_reduction <add>, %187, %cst_87 [1] : vector<1x32xf32> to vector<1xf32>
    %189 = vector.shape_cast %188 : vector<1xf32> to vector<1x1xf32>
    %190 = arith.addf %186, %189 : vector<1x1xf32>
    %cst_88 = arith.constant 0.000000e+00 : f32
    %191 = vector.broadcast %cst_88 : f32 to vector<1x1xf32>
    %c2_89 = arith.constant 2 : index
    %c0_90 = arith.constant 0 : index
    %192 = memref.load %arg3[%c2_89, %c0_90] : memref<4x2xi32, #tpu.memory_space<smem>>
    %c24_i32_91 = arith.constant 24 : i32
    %193 = arith.addi %192, %c24_i32_91 : i32
    %194 = arith.index_cast %193 : i32 to index
    %c0_92 = arith.constant 0 : index
    %195 = vector.load %arg11[%194, %c0_92] : memref<64x32xf32, #tpu.memory_space<vmem>>, vector<1x32xf32>
    %196 = arith.mulf %173, %195 : vector<1x32xf32>
    %cst_93 = arith.constant dense<0.000000e+00> : vector<1xf32>
    %197 = vector.multi_reduction <add>, %196, %cst_93 [1] : vector<1x32xf32> to vector<1xf32>
    %198 = vector.shape_cast %197 : vector<1xf32> to vector<1x1xf32>
    %199 = arith.subf %198, %178 : vector<1x1xf32>
    %200 = math.exp %199 : vector<1x1xf32>
    %201 = arith.addf %191, %200 : vector<1x1xf32>
    %202 = arith.index_cast %193 : i32 to index
    %c0_94 = arith.constant 0 : index
    %203 = vector.load %arg5[%202, %c0_94] : memref<64x32xf32, #tpu.memory_space<vmem>>, vector<1x32xf32>
    %204 = arith.mulf %203, %203 : vector<1x32xf32>
    %cst_95 = arith.constant dense<0.000000e+00> : vector<1xf32>
    %205 = vector.multi_reduction <add>, %204, %cst_95 [1] : vector<1x32xf32> to vector<1xf32>
    %206 = vector.shape_cast %205 : vector<1xf32> to vector<1x1xf32>
    %207 = arith.addf %190, %206 : vector<1x1xf32>
    %c2_96 = arith.constant 2 : index
    %c1_97 = arith.constant 1 : index
    %208 = memref.load %arg3[%c2_96, %c1_97] : memref<4x2xi32, #tpu.memory_space<smem>>
    %c24_i32_98 = arith.constant 24 : i32
    %209 = arith.addi %208, %c24_i32_98 : i32
    %210 = arith.index_cast %209 : i32 to index
    %c0_99 = arith.constant 0 : index
    %211 = vector.load %arg11[%210, %c0_99] : memref<64x32xf32, #tpu.memory_space<vmem>>, vector<1x32xf32>
    %212 = arith.mulf %173, %211 : vector<1x32xf32>
    %cst_100 = arith.constant dense<0.000000e+00> : vector<1xf32>
    %213 = vector.multi_reduction <add>, %212, %cst_100 [1] : vector<1x32xf32> to vector<1xf32>
    %214 = vector.shape_cast %213 : vector<1xf32> to vector<1x1xf32>
    %215 = arith.subf %214, %178 : vector<1x1xf32>
    %216 = math.exp %215 : vector<1x1xf32>
    %217 = arith.addf %201, %216 : vector<1x1xf32>
    %218 = arith.index_cast %209 : i32 to index
    %c0_101 = arith.constant 0 : index
    %219 = vector.load %arg5[%218, %c0_101] : memref<64x32xf32, #tpu.memory_space<vmem>>, vector<1x32xf32>
    %220 = arith.mulf %219, %219 : vector<1x32xf32>
    %cst_102 = arith.constant dense<0.000000e+00> : vector<1xf32>
    %221 = vector.multi_reduction <add>, %220, %cst_102 [1] : vector<1x32xf32> to vector<1xf32>
    %222 = vector.shape_cast %221 : vector<1xf32> to vector<1x1xf32>
    %223 = arith.addf %207, %222 : vector<1x1xf32>
    %cst_103 = arith.constant 1.000000e+00 : f32
    %224 = vector.broadcast %cst_103 : f32 to vector<1x1xf32>
    %225 = arith.addf %224, %217 : vector<1x1xf32>
    %226 = math.log %225 : vector<1x1xf32>
    %227 = arith.addf %168, %226 : vector<1x1xf32>
    %c3 = arith.constant 3 : index
    %228 = memref.load %arg1[%c3] : memref<4xi32, #tpu.memory_space<smem>>
    %c3_104 = arith.constant 3 : index
    %229 = memref.load %arg2[%c3_104] : memref<4xi32, #tpu.memory_space<smem>>
    %c24_i32_105 = arith.constant 24 : i32
    %230 = arith.addi %229, %c24_i32_105 : i32
    %231 = arith.index_cast %228 : i32 to index
    %c0_106 = arith.constant 0 : index
    %232 = vector.load %arg11[%231, %c0_106] : memref<64x32xf32, #tpu.memory_space<vmem>>, vector<1x32xf32>
    %233 = arith.index_cast %230 : i32 to index
    %c0_107 = arith.constant 0 : index
    %234 = vector.load %arg11[%233, %c0_107] : memref<64x32xf32, #tpu.memory_space<vmem>>, vector<1x32xf32>
    %235 = arith.mulf %232, %234 : vector<1x32xf32>
    %cst_108 = arith.constant dense<0.000000e+00> : vector<1xf32>
    %236 = vector.multi_reduction <add>, %235, %cst_108 [1] : vector<1x32xf32> to vector<1xf32>
    %237 = vector.shape_cast %236 : vector<1xf32> to vector<1x1xf32>
    %238 = arith.index_cast %228 : i32 to index
    %c0_109 = arith.constant 0 : index
    %239 = vector.load %arg5[%238, %c0_109] : memref<64x32xf32, #tpu.memory_space<vmem>>, vector<1x32xf32>
    %240 = arith.index_cast %230 : i32 to index
    %c0_110 = arith.constant 0 : index
    %241 = vector.load %arg5[%240, %c0_110] : memref<64x32xf32, #tpu.memory_space<vmem>>, vector<1x32xf32>
    %242 = arith.mulf %239, %239 : vector<1x32xf32>
    %cst_111 = arith.constant dense<0.000000e+00> : vector<1xf32>
    %243 = vector.multi_reduction <add>, %242, %cst_111 [1] : vector<1x32xf32> to vector<1xf32>
    %244 = vector.shape_cast %243 : vector<1xf32> to vector<1x1xf32>
    %245 = arith.addf %223, %244 : vector<1x1xf32>
    %246 = arith.mulf %241, %241 : vector<1x32xf32>
    %cst_112 = arith.constant dense<0.000000e+00> : vector<1xf32>
    %247 = vector.multi_reduction <add>, %246, %cst_112 [1] : vector<1x32xf32> to vector<1xf32>
    %248 = vector.shape_cast %247 : vector<1xf32> to vector<1x1xf32>
    %249 = arith.addf %245, %248 : vector<1x1xf32>
    %cst_113 = arith.constant 0.000000e+00 : f32
    %250 = vector.broadcast %cst_113 : f32 to vector<1x1xf32>
    %c3_114 = arith.constant 3 : index
    %c0_115 = arith.constant 0 : index
    %251 = memref.load %arg3[%c3_114, %c0_115] : memref<4x2xi32, #tpu.memory_space<smem>>
    %c24_i32_116 = arith.constant 24 : i32
    %252 = arith.addi %251, %c24_i32_116 : i32
    %253 = arith.index_cast %252 : i32 to index
    %c0_117 = arith.constant 0 : index
    %254 = vector.load %arg11[%253, %c0_117] : memref<64x32xf32, #tpu.memory_space<vmem>>, vector<1x32xf32>
    %255 = arith.mulf %232, %254 : vector<1x32xf32>
    %cst_118 = arith.constant dense<0.000000e+00> : vector<1xf32>
    %256 = vector.multi_reduction <add>, %255, %cst_118 [1] : vector<1x32xf32> to vector<1xf32>
    %257 = vector.shape_cast %256 : vector<1xf32> to vector<1x1xf32>
    %258 = arith.subf %257, %237 : vector<1x1xf32>
    %259 = math.exp %258 : vector<1x1xf32>
    %260 = arith.addf %250, %259 : vector<1x1xf32>
    %261 = arith.index_cast %252 : i32 to index
    %c0_119 = arith.constant 0 : index
    %262 = vector.load %arg5[%261, %c0_119] : memref<64x32xf32, #tpu.memory_space<vmem>>, vector<1x32xf32>
    %263 = arith.mulf %262, %262 : vector<1x32xf32>
    %cst_120 = arith.constant dense<0.000000e+00> : vector<1xf32>
    %264 = vector.multi_reduction <add>, %263, %cst_120 [1] : vector<1x32xf32> to vector<1xf32>
    %265 = vector.shape_cast %264 : vector<1xf32> to vector<1x1xf32>
    %266 = arith.addf %249, %265 : vector<1x1xf32>
    %c3_121 = arith.constant 3 : index
    %c1_122 = arith.constant 1 : index
    %267 = memref.load %arg3[%c3_121, %c1_122] : memref<4x2xi32, #tpu.memory_space<smem>>
    %c24_i32_123 = arith.constant 24 : i32
    %268 = arith.addi %267, %c24_i32_123 : i32
    %269 = arith.index_cast %268 : i32 to index
    %c0_124 = arith.constant 0 : index
    %270 = vector.load %arg11[%269, %c0_124] : memref<64x32xf32, #tpu.memory_space<vmem>>, vector<1x32xf32>
    %271 = arith.mulf %232, %270 : vector<1x32xf32>
    %cst_125 = arith.constant dense<0.000000e+00> : vector<1xf32>
    %272 = vector.multi_reduction <add>, %271, %cst_125 [1] : vector<1x32xf32> to vector<1xf32>
    %273 = vector.shape_cast %272 : vector<1xf32> to vector<1x1xf32>
    %274 = arith.subf %273, %237 : vector<1x1xf32>
    %275 = math.exp %274 : vector<1x1xf32>
    %276 = arith.addf %260, %275 : vector<1x1xf32>
    %277 = arith.index_cast %268 : i32 to index
    %c0_126 = arith.constant 0 : index
    %278 = vector.load %arg5[%277, %c0_126] : memref<64x32xf32, #tpu.memory_space<vmem>>, vector<1x32xf32>
    %279 = arith.mulf %278, %278 : vector<1x32xf32>
    %cst_127 = arith.constant dense<0.000000e+00> : vector<1xf32>
    %280 = vector.multi_reduction <add>, %279, %cst_127 [1] : vector<1x32xf32> to vector<1xf32>
    %281 = vector.shape_cast %280 : vector<1xf32> to vector<1x1xf32>
    %282 = arith.addf %266, %281 : vector<1x1xf32>
    %cst_128 = arith.constant 1.000000e+00 : f32
    %283 = vector.broadcast %cst_128 : f32 to vector<1x1xf32>
    %284 = arith.addf %283, %276 : vector<1x1xf32>
    %285 = math.log %284 : vector<1x1xf32>
    %286 = arith.addf %227, %285 : vector<1x1xf32>
    %cst_129 = arith.constant 2.500000e-01 : f32
    %287 = vector.broadcast %cst_129 : f32 to vector<1x1xf32>
    %288 = arith.mulf %286, %287 : vector<1x1xf32>
    %cst_130 = arith.constant 1.250000e-05 : f32
    %289 = vector.broadcast %cst_130 : f32 to vector<1x1xf32>
    %290 = arith.mulf %282, %289 : vector<1x1xf32>
    %c0_131 = arith.constant 0 : index
    %c0_132 = arith.constant 0 : index
    %291 = vector.load %arg9[%c0_131, %c0_132] : memref<1x1xf32, #tpu.memory_space<vmem>>, vector<1x1xf32>
    tpu.vector_store %arg9[%c0_131, %c0_132], %288 {strides = array<i32>} : memref<1x1xf32, #tpu.memory_space<vmem>>, vector<1x1xf32>,
    %c0_133 = arith.constant 0 : index
    %c0_134 = arith.constant 0 : index
    %292 = vector.load %arg10[%c0_133, %c0_134] : memref<1x1xf32, #tpu.memory_space<vmem>>, vector<1x1xf32>
    tpu.vector_store %arg10[%c0_133, %c0_134], %290 {strides = array<i32>} : memref<1x1xf32, #tpu.memory_space<vmem>>, vector<1x1xf32>,
    %293 = arith.addf %288, %290 : vector<1x1xf32>
    %c0_135 = arith.constant 0 : index
    %c0_136 = arith.constant 0 : index
    %294 = vector.load %arg8[%c0_135, %c0_136] : memref<1x1xf32, #tpu.memory_space<vmem>>, vector<1x1xf32>
    tpu.vector_store %arg8[%c0_135, %c0_136], %293 {strides = array<i32>} : memref<1x1xf32, #tpu.memory_space<vmem>>, vector<1x1xf32>,
    return
  }
  func.func @transform_0(%arg0: i32, %arg1: memref<4xi32, #tpu.memory_space<smem>>, %arg2: memref<4xi32, #tpu.memory_space<smem>>, %arg3: memref<4x2xi32, #tpu.memory_space<smem>>) -> (i32, i32) {
    %c0_i32 = arith.constant 0 : i32
    %c0_i32_0 = arith.constant 0 : i32
    %c0_i32_1 = arith.constant 0 : i32
    return %c0_i32, %c0_i32_0 : i32, i32
  }
  func.func @transform_1(%arg0: i32, %arg1: memref<4xi32, #tpu.memory_space<smem>>, %arg2: memref<4xi32, #tpu.memory_space<smem>>, %arg3: memref<4x2xi32, #tpu.memory_space<smem>>) -> (i32, i32) {
    %c0_i32 = arith.constant 0 : i32
    %c0_i32_0 = arith.constant 0 : i32
    %c0_i32_1 = arith.constant 0 : i32
    return %c0_i32, %c0_i32_0 : i32, i32
  }
  func.func @transform_2(%arg0: i32, %arg1: memref<4xi32, #tpu.memory_space<smem>>, %arg2: memref<4xi32, #tpu.memory_space<smem>>, %arg3: memref<4x2xi32, #tpu.memory_space<smem>>) -> (i32, i32, i32) {
    %c0_i32 = arith.constant 0 : i32
    %c0_i32_0 = arith.constant 0 : i32
    %c0_i32_1 = arith.constant 0 : i32
    %c0_i32_2 = arith.constant 0 : i32
    return %c0_i32, %c0_i32_0, %c0_i32_1 : i32, i32, i32
  }
  func.func @transform_3(%arg0: i32, %arg1: memref<4xi32, #tpu.memory_space<smem>>, %arg2: memref<4xi32, #tpu.memory_space<smem>>, %arg3: memref<4x2xi32, #tpu.memory_space<smem>>) -> (i32, i32, i32) {
    %c0_i32 = arith.constant 0 : i32
    %c0_i32_0 = arith.constant 0 : i32
    %c0_i32_1 = arith.constant 0 : i32
    %c0_i32_2 = arith.constant 0 : i32
    return %c0_i32, %c0_i32_0, %c0_i32_1 : i32, i32, i32
  }
  func.func @transform_4(%arg0: i32, %arg1: memref<4xi32, #tpu.memory_space<smem>>, %arg2: memref<4xi32, #tpu.memory_space<smem>>, %arg3: memref<4x2xi32, #tpu.memory_space<smem>>) -> (i32, i32) {
    %c0_i32 = arith.constant 0 : i32
    %c0_i32_0 = arith.constant 0 : i32
    %c0_i32_1 = arith.constant 0 : i32
    return %c0_i32, %c0_i32_0 : i32, i32
  }
  func.func @transform_5(%arg0: i32, %arg1: memref<4xi32, #tpu.memory_space<smem>>, %arg2: memref<4xi32, #tpu.memory_space<smem>>, %arg3: memref<4x2xi32, #tpu.memory_space<smem>>) -> (i32, i32) {
    %c0_i32 = arith.constant 0 : i32
    %c0_i32_0 = arith.constant 0 : i32
    %c0_i32_1 = arith.constant 0 : i32
    return %c0_i32, %c0_i32_0 : i32, i32
  }
  func.func @transform_6(%arg0: i32, %arg1: memref<4xi32, #tpu.memory_space<smem>>, %arg2: memref<4xi32, #tpu.memory_space<smem>>, %arg3: memref<4x2xi32, #tpu.memory_space<smem>>) -> (i32, i32) {
    %c0_i32 = arith.constant 0 : i32
    %c0_i32_0 = arith.constant 0 : i32
    %c0_i32_1 = arith.constant 0 : i32
    return %c0_i32, %c0_i32_0 : i32, i32
  }
}

</mosaic_0001>

<bundles_post_ra>
// kernel: ngcf_forward.1
= control target key start
LH: loop header
LB: loop body
LE: loop exit
PB: predicated region body
PF: predicated region fallthrough
CT: control target
= control target key end

     0   :  { %s2249_s0 = inlined_call_operand.vmem [shape: s32[4], index: 0, kind: input, shape index: {}]   ;;  %s2250_s3 = inlined_call_operand.vmem [shape: f32[64,64], index: 3, kind: input, shape index: {}]   ;;  %s2251_s4 = inlined_call_operand.vmem [shape: f32[64,32], index: 4, kind: input, shape index: {}]   ;;  %s2252_s5 = inlined_call_operand.vmem [shape: f32[2,64,32], index: 5, kind: input, shape index: {}]   ;;  %s2253_s6 = inlined_call_operand.vmem [shape: f32[2,1,32], index: 6, kind: input, shape index: {}]   ;;  %s2254_s7 = inlined_call_operand.hbm [shape: f32[1,1], index: 7, kind: output, shape index: {0}]   ;;  %s2255_s8 = inlined_call_operand.hbm [shape: f32[1,1], index: 8, kind: output, shape index: {1}]   ;;  %s2256_s9 = inlined_call_operand.hbm [shape: f32[1,1], index: 9, kind: output, shape index: {2}]   ;;  %s2257_s1 = inlined_call_operand.vmem [shape: s32[4], index: 1, kind: input, shape index: {}]   ;;  %s2258_s2 = inlined_call_operand.vmem [shape: s32[4,2], index: 2, kind: input, shape index: {}]  }
   0x1   :  { %s15_s11 = sshll.u32 %s2249_s0, 4  ;;  %s19_s14 = sshll.u32 %s2257_s1, 4  ;;  %s16_s11 = int_to_ptr.vmem [resolvable:$true] %s15_s11  ;;  %s20_s14 = int_to_ptr.vmem [resolvable:$true] %s19_s14 }
   0x2   :  { %s1545_s15 = scalar_lea.vmem %s16_s11, 16  ;;  %p1550_p1 = scmp.lt.s32.totalorder %s16_s11, %s16_s11 }
   0x3   :  { %p1546_p0 = scmp.ne.s32.totalorder %s16_s11, %s1545_s15  ;;  %p1551_p2 = scmp.lt.s32.totalorder %s1545_s15, %s1545_s15 }
   0x5   :  { %p1552_p3 = por %p1551_p2, %p1550_p1 }
   0x7   :  { %p1553_p4 = pnand %p1552_p3, %p1546_p0 }
   0x9   :  { %1556 = shalt.err (!%p1553_p4)  }
   0xa   :  { %s1647_s16 = smov [#allocation4]   ;;  %s1557_s17 = scalar_lea.vmem %s20_s14, 16 }
   0xb   :  { %18 = dma.vmem_to_smem %s16_s11, 16, %s1647_s16, [#allocation3] }
   0xc   :  { %p1558_p5 = scmp.ne.s32.totalorder %s20_s14, %s1557_s17  ;;  %p1562_p6 = scmp.lt.s32.totalorder %s20_s14, %s20_s14 }
   0xd   :  { %p1563_p7 = scmp.lt.s32.totalorder %s1557_s17, %s1557_s17 }
   0xf   :  { %p1564_p8 = por %p1563_p7, %p1562_p6 }
  0x11   :  { %p1565_p9 = pnand %p1564_p8, %p1558_p5 }
  0x13   :  { %1568 = shalt.err (!%p1565_p9)  }
  0x14   :  { %s1648_s0 = smov [#allocation5]   ;;  %s23_s19 = sshll.u32 %s2258_s2, 4  ;;  %s24_s19 = int_to_ptr.vmem [resolvable:$true] %s23_s19 }
  0x15   :  { %22 = dma.vmem_to_smem %s20_s14, 16, %s1648_s0, [#allocation3] }
  0x16   :  { %s1569_s20 = scalar_lea.vmem %s24_s19, 64  ;;  %p1574_p11 = scmp.lt.s32.totalorder %s24_s19, %s24_s19 }
  0x17   :  { %p1570_p10 = scmp.ne.s32.totalorder %s24_s19, %s1569_s20  ;;  %p1575_p12 = scmp.lt.s32.totalorder %s1569_s20, %s1569_s20 }
  0x19   :  { %p1576_p13 = por %p1575_p12, %p1574_p11 }
  0x1b   :  { %p1577_p0 = pnand %p1576_p13, %p1570_p10 }
  0x1d   :  { %1580 = shalt.err (!%p1577_p0)  }
  0x1e   :  { %s1649_s21 = smov [#allocation6]  }
  0x1f   :  { %26 = dma.vmem_to_smem %s24_s19, 64, %s1649_s21, [#allocation3] }
  0x20   :  { %1641 = dma.done.wait [#allocation3], 96 }
  0x21   :  { %1642 = vsyncadd [#allocation3], 4294967200 }
  0x22   :  { %28 = sfence }
  0x23   :  { %29 = vsyncpa [#allocation8], 0  ;;  %v1716_v0 = vld [vmem:[%s2251_s4 + $0x38] sm:$0xff]  ;;  %v1721_v1 = vld [vmem:[%s2251_s4 + $0x30] sm:$0xff]  ;;  %vm55_vm0 = vcmask 523264  }
  0x24   :  { %1370 = vmatprep.subr.mxu0 %v1716_v0  ;;  %v1728_v2 = vld [vmem:[%s2251_s4 + $0x28] sm:$0xff]  ;;  %v39_v3 = vld [vmem:[%s2250_s3] sm:$0xff] }
  0x25   :  { %1371 = vmatpush3.msra.mxu0 %v1716_v0  ;;  %1386 = vmatprep.mubr.msk.f32.mxu0 %vm55_vm0, %v39_v3  ;;  %v1739_v4 = vld [vmem:[%s2251_s4 + $0x20] sm:$0xff] }
  0x26   :  { %1372 = vmatprep.subr.mxu0 %v1721_v1 }
  0x27   :  { %1373 = vmatpush3.msra.mxu0 %v1721_v1 }
  0x28   :  { %1374 = vmatprep.subr.mxu0 %v1728_v2 }
  0x29   :  { %30 = vsyncpa [#allocation10], 0  ;;  %1375 = vmatpush3.msra.mxu0 %v1728_v2  ;;  %v1746_v5 = vld [vmem:[%s2251_s4 + $0x18] sm:$0xff]  ;;  %v1753_v6 = vld [vmem:[%s2251_s4 + $0x10] sm:$0xff]  ;;  %s1650_s21 = smov 32   ;;  %vm225_vm1 = vcmask 261120  }
  0x2a   :  { %1376 = vmatprep.subr.mxu0 %v1739_v4  ;;  %v1760_v7 = vld [vmem:[%s2251_s4 + $0x8] sm:$0xff]  ;;  %v1767_v8 = vld [vmem:[%s2251_s4] sm:$0xff]  ;;  %v1780_v10 = vld [vmem:[%s2250_s3 + $0x10] sm:$0xff]  ;;  %s2092_s0 = sld [smem:[#allocation6]]  ;;  %vm861_vm2 = vcmask 253952   ;;  %vm1124_vm3 = vcmask 0  }
  0x2b   :  { %1377 = vmatpush3.msra.mxu0 %v1739_v4  ;;  %v1774_v9 = vld [vmem:[%s2250_s3 + $0x8] sm:$0xff]  ;;  %v1790_v11 = vld [vmem:[%s2250_s3 + $0x18] sm:$0xff]  ;;  %v1795_v12 = vld [vmem:[%s2250_s3 + $0x20] sm:$0xff]  ;;  %s2094_s1 = sld [smem:[#allocation5]] }
  0x2c   :  { %1378 = vmatprep.subr.mxu0 %v1746_v5  ;;  %v1804_v13 = vld [vmem:[%s2250_s3 + $0x28] sm:$0xff]  ;;  %v1809_v14 = vld [vmem:[%s2250_s3 + $0x30] sm:$0xff]  ;;  %v1818_v15 = vld [vmem:[%s2250_s3 + $0x38] sm:$0xff]  ;;  %s2100_s18 = sld [smem:[#allocation4 + $0x1]] }
  0x2d   :  { %1379 = vmatpush3.msra.mxu0 %v1746_v5  ;;  %v241_v16 = vld [vmem:[%s2252_s5 + $0x38] sm:$0xff]  ;;  %v240_v17 = vld [vmem:[%s2252_s5 + $0x30] sm:$0xff]  ;;  %v239_v18 = vld [vmem:[%s2252_s5 + $0x28] sm:$0xff]  ;;  %s2102_s19 = sld [smem:[#allocation5 + $0x1]] }
  0x2e   :  { %1380 = vmatprep.subr.mxu0 %v1753_v6  ;;  %1398 = vmatprep.subr.mxu1 %v241_v16  ;;  %v238_v19 = vld [vmem:[%s2252_s5 + $0x20] sm:$0xff]  ;;  %v237_v20 = vld [vmem:[%s2252_s5 + $0x18] sm:$0xff]  ;;  %v236_v21 = vld [vmem:[%s2252_s5 + $0x10] sm:$0xff]  ;;  %s2105_s20 = sld [smem:[#allocation6 + $0x1]] }
  0x2f   :  { %1381 = vmatpush3.msra.mxu0 %v1753_v6  ;;  %1399 = vmatpush3.msra.mxu1 %v241_v16  ;;  %v235_v22 = vld [vmem:[%s2252_s5 + $0x8] sm:$0xff]  ;;  %v234_v23 = vld [vmem:[%s2252_s5] sm:$0xff]  ;;  %s2110_s22 = sld [smem:[#allocation6 + $0x80]] }
  0x30   :  { %1382 = vmatprep.subr.mxu0 %v1760_v7  ;;  %1400 = vmatprep.subr.mxu1 %v240_v17  ;;  %v1234_v60 = vld [vmem:[%s2253_s6] ss:$0 sm:$0xff]  ;;  %s2113_s23 = sld [smem:[#allocation4 + $0x2]]  ;;  %s1176_s29 = scalar_lea.vmem [#allocation2], %s2092_s0 }
  0x31   :  { %1383 = vmatpush3.msra.mxu0 %v1760_v7  ;;  %1401 = vmatpush3.msra.mxu1 %v240_v17  ;;  %s2115_s2 = sld [smem:[#allocation6 + $0x100]]  ;;  %s1171_s30 = scalar_lea.vmem [#allocation2], %s2094_s1 }
  0x32   :  { %1384 = vmatprep.subr.mxu0 %v1767_v8  ;;  %1402 = vmatprep.subr.mxu1 %v239_v18  ;;  %s2117_s24 = sld [smem:[#allocation5 + $0x2]]  ;;  %s924_s10 = scalar_lea.vmem [#allocation2], %s2100_s18 }
  0x33   :  { %1385 = vmatpush3.msra.mxu0 %v1767_v8  ;;  %1403 = vmatpush3.msra.mxu1 %v239_v18  ;;  %s2119_s25 = sld [smem:[#allocation4 + $0x3]]  ;;  %s1185_s11 = scalar_lea.vmem [#allocation2], %s2102_s19 }
  0x34   :  { %1387 = vmatmul.mubr.msk.f32.vlgmr.msra.gmra.mxu0 %vm55_vm0, %v1774_v9  ;;  %1404 = vmatprep.subr.mxu1 %v238_v19  ;;  %s2121_s26 = sld [smem:[#allocation5 + $0x3]]  ;;  %s1180_s12 = scalar_lea.vmem [#allocation2], %s2105_s20 }
  0x35   :  { %1389 = vmatprep.mubr.msk.f32.mxu0 %vm55_vm0, %v1780_v10  ;;  %1405 = vmatpush3.msra.mxu1 %v238_v19  ;;  %s2123_s27 = sld [smem:[#allocation6 + $0x101]]  ;;  %s1190_s14 = scalar_lea.vmem [#allocation2], %s2110_s22 }
  0x36   :  { %1406 = vmatprep.subr.mxu1 %v237_v20  ;;  %s2133_s13 = sld [smem:[#allocation6 + $0x181]]  ;;  %s991_s16 = scalar_lea.vmem [#allocation2], %s2113_s23 }
  0x37   :  { %1407 = vmatpush3.msra.mxu1 %v237_v20  ;;  %s2137_s15 = sld [smem:[#allocation6 + $0x180]] }
  0x38   :  { %1390 = vmatmul.mubr.msk.f32.gmra.mxu0 %vm55_vm0, %v1790_v11  ;;  %1408 = vmatprep.subr.mxu1 %v236_v21  ;;  %s1199_s17 = scalar_lea.vmem [#allocation2], %s2117_s24 }
  0x39   :  { %1392 = vmatprep.mubr.msk.f32.mxu0 %vm55_vm0, %v1795_v12  ;;  %1409 = vmatpush3.msra.mxu1 %v236_v21 }
  0x3a   :  { %1410 = vmatprep.subr.mxu1 %v235_v22 }
  0x3b   :  { %1411 = vmatpush3.msra.mxu1 %v235_v22 }
  0x3c   :  { %1393 = vmatmul.mubr.msk.f32.gmra.mxu0 %vm55_vm0, %v1804_v13  ;;  %1412 = vmatprep.subr.mxu1 %v234_v23 }
  0x3d   :  { %1395 = vmatprep.mubr.msk.f32.mxu0 %vm55_vm0, %v1809_v14  ;;  %1413 = vmatpush3.msra.mxu1 %v234_v23 }
  0x40   :  { %1396 = vmatmul.mubr.msk.f32.gmra.mxu0 %vm55_vm0, %v1818_v15 }
  0x41   :  { %1442 = vmatprep.mubr.msk.f32.mxu0 %vm55_vm0, %v39_v3 }
  0xf4   :  { %v1388_v24 = vpop.f32.mrf.mxu0 }
  0xf5   :  { %v186_v29 = vmul.f32 %v1388_v24, %v1760_v7 }
  0xf6   :  { %v146_v25 = vpop.f32.mrf.mxu0 }
  0xf7   :  { %v185_v26 = vmul.f32 %v146_v25, %v1767_v8 }
  0xf8   :  { %v1391_v27 = vpop.f32.mrf.mxu0 }
  0xf9   :  { %201 = vrot.lane.b32.xlu0 %v185_v26, %s1650_s21  ;;  %v188_v33 = vmul.f32 %v1391_v27, %v1746_v5 }
  0xfa   :  { %v156_v28 = vpop.f32.mrf.mxu0 }
  0xfb   :  { %v187_v30 = vmul.f32 %v156_v28, %v1753_v6 }
  0xfc   :  { %v1394_v31 = vpop.f32.mrf.mxu0 }
  0xfd   :  { %203 = vrot.lane.b32.xlu0 %v186_v29, %s1650_s21  ;;  %205 = vrot.lane.b32.xlu1 %v187_v30, %s1650_s21  ;;  %v190_v37 = vmul.f32 %v1394_v31, %v1728_v2 }
  0xfe   :  { %v166_v32 = vpop.f32.mrf.mxu0 }
  0xff   :  { %v189_v34 = vmul.f32 %v166_v32, %v1739_v4 }
 0x100   :  { %v1397_v35 = vpop.f32.mrf.mxu0 }
 0x101   :  { %207 = vrot.lane.b32.xlu1 %v188_v33, %s1650_s21  ;;  %209 = vrot.lane.b32.xlu0 %v189_v34, %s1650_s21  ;;  %v192_v39 = vmul.f32 %v1397_v35, %v1716_v0 }
 0x102   :  { %v176_v36 = vpop.f32.mrf.mxu0 }
 0x103   :  { %v191_v38 = vmul.f32 %v176_v36, %v1721_v1 }
 0x105   :  { %211 = vrot.lane.b32.xlu1 %v190_v37, %s1650_s21  ;;  %213 = vrot.lane.b32.xlu0 %v191_v38, %s1650_s21 }
 0x109   :  { %215 = vrot.lane.b32.xlu1 %v192_v39, %s1650_s21 }
 0x16b   :  { %v202_v40 = vpop.permute.xlu0 %201 }
 0x16c   :  { %v226_v41 = vsel %vm225_vm1, %v146_v25, %v202_v40 }
 0x16d   :  { %1414 = vmatprep.mubr.msk.f32.mxu1 %vm55_vm0, %v226_v41 }
 0x16f   :  { %v204_v42 = vpop.permute.xlu0 %203  ;;  %v206_v43 = vpop.permute.xlu1 %205 }
 0x170   :  { %v227_v44 = vsel %vm225_vm1, %v1388_v24, %v204_v42  ;;  %v228_v45 = vsel %vm225_vm1, %v156_v28, %v206_v43 }
 0x171   :  { %1415 = vmatmul.mubr.msk.f32.vlgmr.msra.gmra.mxu1 %vm55_vm0, %v227_v44 }
 0x172   :  { %1417 = vmatprep.mubr.msk.f32.mxu1 %vm55_vm0, %v228_v45 }
 0x173   :  { %v208_v46 = vpop.permute.xlu1 %207  ;;  %v210_v47 = vpop.permute.xlu0 %209 }
 0x174   :  { %v229_v48 = vsel %vm225_vm1, %v1391_v27, %v208_v46  ;;  %v230_v49 = vsel %vm225_vm1, %v166_v32, %v210_v47 }
 0x175   :  { %1418 = vmatmul.mubr.msk.f32.gmra.mxu1 %vm55_vm0, %v229_v48 }
 0x176   :  { %1420 = vmatprep.mubr.msk.f32.mxu1 %vm55_vm0, %v230_v49 }
 0x177   :  { %v212_v50 = vpop.permute.xlu1 %211  ;;  %v214_v51 = vpop.permute.xlu0 %213 }
 0x178   :  { %v231_v52 = vsel %vm225_vm1, %v1394_v31, %v212_v50  ;;  %v232_v53 = vsel %vm225_vm1, %v176_v36, %v214_v51 }
 0x179   :  { %1421 = vmatmul.mubr.msk.f32.gmra.mxu1 %vm55_vm0, %v231_v52 }
 0x17a   :  { %1423 = vmatprep.mubr.msk.f32.mxu1 %vm55_vm0, %v232_v53 }
 0x17b   :  { %v216_v54 = vpop.permute.xlu1 %215 }
 0x17c   :  { %v233_v55 = vsel %vm225_vm1, %v1397_v35, %v216_v54 }
 0x17d   :  { %1424 = vmatmul.mubr.msk.f32.gmra.mxu1 %vm55_vm0, %v233_v55 }
 0x231   :  { %v1416_v56 = vpop.f32.mrf.mxu1 }
 0x232   :  { %v345_v21 = vadd.f32 %v1416_v56, %v1234_v60 }
 0x233   :  { %v339_v57 = vpop.f32.mrf.mxu1 }
 0x234   :  { %v379_v30 = vmul.f32 0.2, %v345_v21  ;;  %v340_v34 = vadd.f32 %v1234_v60, %v339_v57 }
 0x235   :  { %v1419_v58 = vpop.f32.mrf.mxu1 }
 0x236   :  { %v355_v3 = vadd.f32 %v1419_v58, %v1234_v60  ;;  %v1891_v40 = vmax.f32 %v345_v21, %v379_v30  ;;  %v378_v43 = vmul.f32 0.2, %v340_v34 }
 0x237   :  { %v349_v59 = vpop.f32.mrf.mxu1 }
 0x238   :  { %v381_v22 = vmul.f32 0.2, %v355_v3  ;;  %v350_v25 = vadd.f32 %v1234_v60, %v349_v59  ;;  %v395_v48 = vmul.f32 %v1891_v40, %v1891_v40  ;;  %v1904_v49 = vmax.f32 %v340_v34, %v378_v43 }
 0x239   :  { %v1422_v61 = vpop.f32.mrf.mxu1 }
 0x23a   :  { %v365_v62 = vadd.f32 %v1422_v61, %v1234_v60  ;;  %v1884_v31 = vmax.f32 %v355_v3, %v381_v22  ;;  %v380_v35 = vmul.f32 0.2, %v350_v25  ;;  %v405_v52 = vsel %vm225_vm1, %v395_v48, 0.0 }
 0x23b   :  { %v359_v63 = vpop.f32.mrf.mxu1  ;;  %v394_v54 = vmul.f32 %v1904_v49, %v1904_v49 }
 0x23c   :  { %v383_v17 = vmul.f32 0.2, %v365_v62  ;;  %v360_v18 = vadd.f32 %v1234_v60, %v359_v63  ;;  %v397_v42 = vmul.f32 %v1884_v31, %v1884_v31  ;;  %v1896_v44 = vmax.f32 %v350_v25, %v380_v35 }
 0x23d   :  { %v1425_v16 = vpop.f32.mrf.mxu1  ;;  %v402_v55 = vsel %vm225_vm1, %v394_v54, 0.0 }
 0x23e   :  { %v375_v19 = vadd.f32 %v1425_v16, %v1234_v60  ;;  %v1882_v26 = vmax.f32 %v365_v62, %v383_v17  ;;  %v382_v27 = vmul.f32 0.2, %v360_v18  ;;  %v411_v47 = vsel %vm225_vm1, %v397_v42, 0.0 }
 0x23f   :  { %v369_v20 = vpop.f32.mrf.mxu1  ;;  %v396_v51 = vmul.f32 %v1896_v44, %v1896_v44 }
 0x240   :  { %v385_v23 = vmul.f32 0.2, %v375_v19  ;;  %v370_v24 = vadd.f32 %v1234_v60, %v369_v20  ;;  %v1886_v36 = vmax.f32 %v360_v18, %v382_v27  ;;  %v399_v39 = vmul.f32 %v1882_v26, %v1882_v26 }
 0x241   :  { %v408_v53 = vsel %vm225_vm1, %v396_v51, 0.0 }
 0x242   :  { %v393_v28 = vmax.f32 %v375_v19, %v385_v23  ;;  %v384_v29 = vmul.f32 0.2, %v370_v24  ;;  %v417_v45 = vsel %vm225_vm1, %v399_v39, 0.0  ;;  %v398_v46 = vmul.f32 %v1886_v36, %v1886_v36  ;;  %v1251_v39 = vld [vmem:[%s2252_s5 + $0x40] sm:$0xff] }
 0x244   :  { %v392_v32 = vmax.f32 %v370_v24, %v384_v29  ;;  %v401_v33 = vmul.f32 %v393_v28, %v393_v28  ;;  %v414_v50 = vsel %vm225_vm1, %v398_v46, 0.0 }
 0x246   :  { %v423_v37 = vsel %vm225_vm1, %v401_v33, 0.0  ;;  %v400_v38 = vmul.f32 %v392_v32, %v392_v32 }
 0x247   :  { %424 = vadd.xlane.f32.xlu0 %v423_v37 }
 0x248   :  { %v420_v41 = vsel %vm225_vm1, %v400_v38, 0.0 }
 0x249   :  { %421 = vadd.xlane.f32.xlu1 %v420_v41 }
 0x24b   :  { %418 = vadd.xlane.f32.xlu0 %v417_v45 }
 0x24d   :  { %412 = vadd.xlane.f32.xlu1 %v411_v47 }
 0x24f   :  { %415 = vadd.xlane.f32.xlu0 %v414_v50 }
 0x251   :  { %406 = vadd.xlane.f32.xlu1 %v405_v52 }
 0x253   :  { %409 = vadd.xlane.f32.xlu0 %v408_v53 }
 0x257   :  { %403 = vadd.xlane.f32.xlu0 %v402_v55 }
 0x2d0   :  { %v425_v56 = vpop.xlane.xlu0 %424 }
 0x2d1   :  { %v433_v57 = vmax.f32 %v425_v56, 1e-24 }
 0x2d2   :  { %v422_v58 = vpop.xlane.xlu1 %421 }
 0x2d3   :  { %1489 = vrsqrt.f32 %v433_v57  ;;  %v432_v59 = vmax.f32 %v422_v58, 1e-24 }
 0x2d4   :  { %v419_v60 = vpop.xlane.xlu0 %418 }
 0x2d5   :  { %1491 = vrsqrt.f32 %v432_v59  ;;  %v431_v61 = vmax.f32 %v419_v60, 1e-24 }
 0x2d6   :  { %v413_v62 = vpop.xlane.xlu1 %412 }
 0x2d7   :  { %1493 = vrsqrt.f32 %v431_v61  ;;  %v429_v63 = vmax.f32 %v413_v62, 1e-24 }
 0x2d8   :  { %v416_v3 = vpop.xlane.xlu0 %415 }
 0x2d9   :  { %v430_v16 = vmax.f32 %v416_v3, 1e-24  ;;  %1495 = vrsqrt.f32 %v429_v63 }
 0x2da   :  { %v407_v17 = vpop.xlane.xlu1 %406 }
 0x2db   :  { %1497 = vrsqrt.f32 %v430_v16  ;;  %v427_v18 = vmax.f32 %v407_v17, 1e-24 }
 0x2dc   :  { %v410_v19 = vpop.xlane.xlu0 %409 }
 0x2dd   :  { %v428_v20 = vmax.f32 %v410_v19, 1e-24  ;;  %1499 = vrsqrt.f32 %v427_v18 }
 0x2df   :  { %1501 = vrsqrt.f32 %v428_v20 }
 0x2e0   :  { %v1490_v21 = vpop.eup %1489  ;;  %v404_v22 = vpop.xlane.xlu0 %403 }
 0x2e1   :  { %v426_v23 = vmax.f32 %v404_v22, 1e-24  ;;  %v1914_v24 = vmul.f32 %v1490_v21, %v393_v28 }
 0x2e2   :  { %v1492_v25 = vpop.eup %1491 }
 0x2e3   :  { %1503 = vrsqrt.f32 %v426_v23  ;;  %1426 = vmatprep.subr.mxu0 %v1914_v24  ;;  %v1917_v27 = vmul.f32 %v1492_v25, %v392_v32  ;;  %v1260_v23 = vld [vmem:[%s2253_s6 + $0x1] ss:$0 sm:$0xff]  ;;  %s2086_s6 = sld [smem:[#allocation4]] }
 0x2e4   :  { %v1494_v29 = vpop.eup %1493  ;;  %1427 = vmatpush3.msra.mxu0 %v1914_v24 }
 0x2e5   :  { %1428 = vmatprep.subr.mxu0 %v1917_v27  ;;  %v1922_v30 = vmul.f32 %v1494_v29, %v1882_v26 }
 0x2e6   :  { %1429 = vmatpush3.msra.mxu0 %v1917_v27  ;;  %v1496_v33 = vpop.eup %1495 }
 0x2e7   :  { %1430 = vmatprep.subr.mxu0 %v1922_v30  ;;  %v1932_v35 = vmul.f32 %v1496_v33, %v1884_v31 }
 0x2e8   :  { %v1498_v28 = vpop.eup %1497  ;;  %1431 = vmatpush3.msra.mxu0 %v1922_v30 }
 0x2e9   :  { %v1928_v34 = vmul.f32 %v1498_v28, %v1886_v36  ;;  %s856_s28 = scalar_lea.vmem [#allocation2], %s2086_s6 }
 0x2ea   :  { %v1500_v32 = vpop.eup %1499 }
 0x2eb   :  { %1432 = vmatprep.subr.mxu0 %v1928_v34  ;;  %v1942_v36 = vmul.f32 %v1500_v32, %v1891_v40 }
 0x2ec   :  { %v1502_v37 = vpop.eup %1501  ;;  %1433 = vmatpush3.msra.mxu0 %v1928_v34 }
 0x2ed   :  { %1434 = vmatprep.subr.mxu0 %v1932_v35  ;;  %v1937_v26 = vmul.f32 %v1502_v37, %v1896_v44 }
 0x2ee   :  { %1435 = vmatpush3.msra.mxu0 %v1932_v35 }
 0x2ef   :  { %1436 = vmatprep.subr.mxu0 %v1937_v26 }
 0x2f0   :  { %v1504_v38 = vpop.eup %1503  ;;  %1437 = vmatpush3.msra.mxu0 %v1937_v26 }
 0x2f1   :  { %1438 = vmatprep.subr.mxu0 %v1942_v36  ;;  %v1947_v31 = vmul.f32 %v1504_v38, %v1904_v49 }
 0x2f2   :  { %1439 = vmatpush3.msra.mxu0 %v1942_v36 }
 0x2f3   :  { %1440 = vmatprep.subr.mxu0 %v1947_v31 }
 0x2f4   :  { %1441 = vmatpush3.msra.mxu0 %v1947_v31 }
 0x2f5   :  { %1443 = vmatmul.mubr.msk.f32.vlgmr.msra.gmra.mxu0 %vm55_vm0, %v1774_v9  ;;  %v1258_v9 = vld [vmem:[%s2252_s5 + $0x78] sm:$0xff] }
 0x2f6   :  { %1445 = vmatprep.mubr.msk.f32.mxu0 %vm55_vm0, %v1780_v10  ;;  %v1257_v10 = vld [vmem:[%s2252_s5 + $0x70] sm:$0xff]  ;;  %1454 = vmatprep.subr.mxu1 %v1258_v9 }
 0x2f7   :  { %1455 = vmatpush3.msra.mxu1 %v1258_v9 }
 0x2f8   :  { %1456 = vmatprep.subr.mxu1 %v1257_v10 }
 0x2f9   :  { %1446 = vmatmul.mubr.msk.f32.gmra.mxu0 %vm55_vm0, %v1790_v11  ;;  %v1256_v11 = vld [vmem:[%s2252_s5 + $0x68] sm:$0xff]  ;;  %1457 = vmatpush3.msra.mxu1 %v1257_v10 }
 0x2fa   :  { %1448 = vmatprep.mubr.msk.f32.mxu0 %vm55_vm0, %v1795_v12  ;;  %v1255_v12 = vld [vmem:[%s2252_s5 + $0x60] sm:$0xff]  ;;  %1458 = vmatprep.subr.mxu1 %v1256_v11 }
 0x2fb   :  { %1459 = vmatpush3.msra.mxu1 %v1256_v11 }
 0x2fc   :  { %1460 = vmatprep.subr.mxu1 %v1255_v12 }
 0x2fd   :  { %1449 = vmatmul.mubr.msk.f32.gmra.mxu0 %vm55_vm0, %v1804_v13  ;;  %v1254_v13 = vld [vmem:[%s2252_s5 + $0x58] sm:$0xff]  ;;  %1461 = vmatpush3.msra.mxu1 %v1255_v12 }
 0x2fe   :  { %1451 = vmatprep.mubr.msk.f32.mxu0 %vm55_vm0, %v1809_v14  ;;  %v1253_v14 = vld [vmem:[%s2252_s5 + $0x50] sm:$0xff]  ;;  %1462 = vmatprep.subr.mxu1 %v1254_v13 }
 0x2ff   :  { %1463 = vmatpush3.msra.mxu1 %v1254_v13 }
 0x300   :  { %1464 = vmatprep.subr.mxu1 %v1253_v14 }
 0x301   :  { %1452 = vmatmul.mubr.msk.f32.gmra.mxu0 %vm55_vm0, %v1818_v15  ;;  %1465 = vmatpush3.msra.mxu1 %v1253_v14  ;;  %v1252_v15 = vld [vmem:[%s2252_s5 + $0x48] sm:$0xff]  ;;  %s1204_s5 = scalar_lea.vmem [#allocation2], %s2115_s2 }
 0x302   :  { %1466 = vmatprep.subr.mxu1 %v1252_v15 }
 0x303   :  { %1467 = vmatpush3.msra.mxu1 %v1252_v15 }
 0x304   :  { %1468 = vmatprep.subr.mxu1 %v1251_v39 }
 0x305   :  { %1469 = vmatpush3.msra.mxu1 %v1251_v39 }
 0x3b5   :  { %v1444_v40 = vpop.f32.mrf.mxu0 }
 0x3b6   :  { %v564_v41 = vmul.f32 %v1444_v40, %v1942_v36 }
 0x3b7   :  { %v524_v42 = vpop.f32.mrf.mxu0 }
 0x3b8   :  { %v563_v43 = vmul.f32 %v524_v42, %v1947_v31  ;;  %581 = vrot.lane.b32.xlu0 %v564_v41, %s1650_s21 }
 0x3b9   :  { %v1447_v44 = vpop.f32.mrf.mxu0 }
 0x3ba   :  { %579 = vrot.lane.b32.xlu1 %v563_v43, %s1650_s21  ;;  %v566_v49 = vmul.f32 %v1447_v44, %v1932_v35 }
 0x3bb   :  { %v534_v45 = vpop.f32.mrf.mxu0 }
 0x3bc   :  { %v565_v46 = vmul.f32 %v534_v45, %v1937_v26 }
 0x3bd   :  { %v1450_v47 = vpop.f32.mrf.mxu0 }
 0x3be   :  { %583 = vrot.lane.b32.xlu1 %v565_v46, %s1650_s21  ;;  %v568_v53 = vmul.f32 %v1450_v47, %v1922_v30 }
 0x3bf   :  { %v544_v48 = vpop.f32.mrf.mxu0 }
 0x3c0   :  { %v567_v50 = vmul.f32 %v544_v48, %v1928_v34 }
 0x3c1   :  { %v1453_v51 = vpop.f32.mrf.mxu0 }
 0x3c2   :  { %585 = vrot.lane.b32.xlu1 %v566_v49, %s1650_s21  ;;  %587 = vrot.lane.b32.xlu0 %v567_v50, %s1650_s21  ;;  %v570_v55 = vmul.f32 %v1453_v51, %v1914_v24 }
 0x3c3   :  { %v554_v52 = vpop.f32.mrf.mxu0 }
 0x3c4   :  { %v569_v54 = vmul.f32 %v554_v52, %v1917_v27 }
 0x3c6   :  { %589 = vrot.lane.b32.xlu1 %v568_v53, %s1650_s21  ;;  %591 = vrot.lane.b32.xlu0 %v569_v54, %s1650_s21 }
 0x3ca   :  { %593 = vrot.lane.b32.xlu1 %v570_v55, %s1650_s21  ;;  %s2107_s21 = sld [smem:[#allocation6 + $0x81]] }
 0x3d0   :  { %s1194_s3 = scalar_lea.vmem [#allocation2], %s2107_s21 }
 0x42a   :  { %v582_v56 = vpop.permute.xlu0 %581 }
 0x42b   :  { %v604_v59 = vsel %vm225_vm1, %v1444_v40, %v582_v56 }
 0x42c   :  { %v580_v57 = vpop.permute.xlu1 %579 }
 0x42d   :  { %v603_v58 = vsel %vm225_vm1, %v524_v42, %v580_v57 }
 0x42e   :  { %1470 = vmatprep.mubr.msk.f32.mxu1 %vm55_vm0, %v603_v58 }
 0x42f   :  { %1471 = vmatmul.mubr.msk.f32.vlgmr.msra.gmra.mxu1 %vm55_vm0, %v604_v59 }
 0x430   :  { %v584_v60 = vpop.permute.xlu1 %583 }
 0x431   :  { %v605_v61 = vsel %vm225_vm1, %v534_v45, %v584_v60 }
 0x432   :  { %1473 = vmatprep.mubr.msk.f32.mxu1 %vm55_vm0, %v605_v61 }
 0x434   :  { %v586_v62 = vpop.permute.xlu1 %585  ;;  %v588_v63 = vpop.permute.xlu0 %587 }
 0x435   :  { %v606_v3 = vsel %vm225_vm1, %v1447_v44, %v586_v62  ;;  %v607_v16 = vsel %vm225_vm1, %v544_v48, %v588_v63 }
 0x436   :  { %1474 = vmatmul.mubr.msk.f32.gmra.mxu1 %vm55_vm0, %v606_v3 }
 0x437   :  { %1476 = vmatprep.mubr.msk.f32.mxu1 %vm55_vm0, %v607_v16 }
 0x438   :  { %v590_v17 = vpop.permute.xlu1 %589  ;;  %v592_v18 = vpop.permute.xlu0 %591 }
 0x439   :  { %v608_v19 = vsel %vm225_vm1, %v1450_v47, %v590_v17  ;;  %v609_v20 = vsel %vm225_vm1, %v554_v52, %v592_v18 }
 0x43a   :  { %1477 = vmatmul.mubr.msk.f32.gmra.mxu1 %vm55_vm0, %v608_v19 }
 0x43b   :  { %1479 = vmatprep.mubr.msk.f32.mxu1 %vm55_vm0, %v609_v20 }
 0x43c   :  { %v594_v21 = vpop.permute.xlu1 %593 }
 0x43d   :  { %v610_v22 = vsel %vm225_vm1, %v1453_v51, %v594_v21 }
 0x43e   :  { %1480 = vmatmul.mubr.msk.f32.gmra.mxu1 %vm55_vm0, %v610_v22 }
 0x4ef   :  { %v1472_v25 = vpop.f32.mrf.mxu1 }
 0x4f0   :  { %v724_v29 = vadd.f32 %v1472_v25, %v1260_v23 }
 0x4f1   :  { %v718_v33 = vpop.f32.mrf.mxu1 }
 0x4f2   :  { %v758_v28 = vmul.f32 0.2, %v724_v29  ;;  %v719_v32 = vadd.f32 %v1260_v23, %v718_v33 }
 0x4f4   :  { %v2025_v37 = vmax.f32 %v724_v29, %v758_v28  ;;  %v757_v38 = vmul.f32 0.2, %v719_v32 }
 0x4f6   :  { %v2027_v9 = vmax.f32 %v719_v32, %v757_v38  ;;  %v1475_v10 = vpop.f32.mrf.mxu1  ;;  %v774_v11 = vmul.f32 %v2025_v37, %v2025_v37 }
 0x4f7   :  { %v734_v12 = vadd.f32 %v1475_v10, %v1260_v23 }
 0x4f8   :  { %v728_v13 = vpop.f32.mrf.mxu1  ;;  %v784_v14 = vsel %vm225_vm1, %v774_v11, 0.0  ;;  %v773_v15 = vmul.f32 %v2027_v9, %v2027_v9 }
 0x4f9   :  { %v760_v39 = vmul.f32 0.2, %v734_v12  ;;  %v729_v40 = vadd.f32 %v1260_v23, %v728_v13  ;;  %785 = vadd.xlane.f32.xlu1 %v784_v14 }
 0x4fa   :  { %v1478_v41 = vpop.f32.mrf.mxu1  ;;  %v781_v42 = vsel %vm225_vm1, %v773_v15, 0.0 }
 0x4fb   :  { %v2035_v43 = vmax.f32 %v734_v12, %v760_v39  ;;  %v759_v44 = vmul.f32 0.2, %v729_v40  ;;  %v744_v45 = vadd.f32 %v1478_v41, %v1260_v23  ;;  %782 = vadd.xlane.f32.xlu0 %v781_v42 }
 0x4fc   :  { %v738_v46 = vpop.f32.mrf.mxu1 }
 0x4fd   :  { %v2037_v47 = vmax.f32 %v729_v40, %v759_v44  ;;  %v762_v48 = vmul.f32 0.2, %v744_v45  ;;  %v739_v49 = vadd.f32 %v1260_v23, %v738_v46  ;;  %v776_v50 = vmul.f32 %v2035_v43, %v2035_v43 }
 0x4fe   :  { %v1481_v51 = vpop.f32.mrf.mxu1  ;;  %v451_v40 = vadd.f32 %v1942_v36, %v1760_v7  ;;  %v450_v46 = vadd.f32 %v1947_v31, %v1767_v8  ;;  %v453_v36 = vadd.f32 %v1932_v35, %v1746_v5 }
 0x4ff   :  { %v2041_v52 = vmax.f32 %v744_v45, %v762_v48  ;;  %v761_v53 = vmul.f32 0.2, %v739_v49  ;;  %v754_v54 = vadd.f32 %v1481_v51, %v1260_v23  ;;  %v790_v55 = vsel %vm225_vm1, %v776_v50, 0.0 }
 0x500   :  { %791 = vadd.xlane.f32.xlu0 %v790_v55  ;;  %v748_v56 = vpop.f32.mrf.mxu1  ;;  %v775_v57 = vmul.f32 %v2037_v47, %v2037_v47 }
 0x501   :  { %v2046_v58 = vmax.f32 %v739_v49, %v761_v53  ;;  %v764_v59 = vmul.f32 0.2, %v754_v54  ;;  %v749_v60 = vadd.f32 %v1260_v23, %v748_v56  ;;  %v778_v61 = vmul.f32 %v2041_v52, %v2041_v52 }
 0x502   :  { %v787_v3 = vsel %vm225_vm1, %v775_v57, 0.0 }
 0x503   :  { %v2050_v62 = vmax.f32 %v754_v54, %v764_v59  ;;  %v763_v63 = vmul.f32 0.2, %v749_v60  ;;  %v777_v16 = vmul.f32 %v2046_v58, %v2046_v58  ;;  %v796_v19 = vsel %vm225_vm1, %v778_v61, 0.0 }
 0x504   :  { %788 = vadd.xlane.f32.xlu0 %v787_v3 }
 0x505   :  { %v2055_v17 = vmax.f32 %v749_v60, %v763_v63  ;;  %v793_v18 = vsel %vm225_vm1, %v777_v16, 0.0  ;;  %v780_v21 = vmul.f32 %v2050_v62, %v2050_v62  ;;  %v454_v60 = vadd.f32 %v1928_v34, %v1739_v4 }
 0x506   :  { %794 = vadd.xlane.f32.xlu1 %v793_v18 }
 0x507   :  { %v779_v20 = vmul.f32 %v2055_v17, %v2055_v17  ;;  %v802_v23 = vsel %vm225_vm1, %v780_v21, 0.0 }
 0x508   :  { %797 = vadd.xlane.f32.xlu0 %v796_v19 }
 0x509   :  { %v799_v22 = vsel %vm225_vm1, %v779_v20, 0.0 }
 0x50a   :  { %800 = vadd.xlane.f32.xlu1 %v799_v22 }
 0x50c   :  { %803 = vadd.xlane.f32.xlu0 %v802_v23 }
 0x582   :  { %v786_v25 = vpop.xlane.xlu1 %785 }
 0x583   :  { %v806_v29 = vmax.f32 %v786_v25, 1e-24 }
 0x584   :  { %v783_v33 = vpop.xlane.xlu0 %782 }
 0x585   :  { %1505 = vrsqrt.f32 %v806_v29  ;;  %v805_v28 = vmax.f32 %v783_v33, 1e-24 }
 0x587   :  { %1507 = vrsqrt.f32 %v805_v28 }
 0x589   :  { %v792_v32 = vpop.xlane.xlu0 %791 }
 0x58a   :  { %v808_v38 = vmax.f32 %v792_v32, 1e-24 }
 0x58c   :  { %1509 = vrsqrt.f32 %v808_v38 }
 0x58d   :  { %v789_v10 = vpop.xlane.xlu0 %788 }
 0x58e   :  { %v807_v11 = vmax.f32 %v789_v10, 1e-24 }
 0x58f   :  { %v795_v12 = vpop.xlane.xlu1 %794 }
 0x590   :  { %1511 = vrsqrt.f32 %v807_v11  ;;  %v809_v13 = vmax.f32 %v795_v12, 1e-24 }
 0x591   :  { %v798_v14 = vpop.xlane.xlu0 %797 }
 0x592   :  { %v1506_v15 = vpop.eup %1505  ;;  %1513 = vrsqrt.f32 %v809_v13  ;;  %v810_v39 = vmax.f32 %v798_v14, 1e-24 }
 0x593   :  { %v822_v41 = vmul.f32 %v1506_v15, %v2025_v37  ;;  %v801_v42 = vpop.xlane.xlu1 %800 }
 0x594   :  { %v1508_v44 = vpop.eup %1507  ;;  %1515 = vrsqrt.f32 %v810_v39  ;;  %v811_v45 = vmax.f32 %v801_v42, 1e-24 }
 0x595   :  { %v830_v48 = vadd.f32 %v822_v41, %v451_v40  ;;  %v821_v49 = vmul.f32 %v1508_v44, %v2027_v9  ;;  %v804_v50 = vpop.xlane.xlu0 %803  ;;  %v452_v9 = vadd.f32 %v1937_v26, %v1753_v6 }
 0x596   :  { %1517 = vrsqrt.f32 %v811_v45  ;;  %v812_v51 = vmax.f32 %v804_v50, 1e-24 }
 0x597   :  { %v838_v53 = vmul.f32 0.33333334, %v830_v48  ;;  %v829_v54 = vadd.f32 %v821_v49, %v450_v46 }
 0x598   :  { %1519 = vrsqrt.f32 %v812_v51 }
 0x599   :  { %v1510_v55 = vpop.eup %1509  ;;  %846 = vst.msk [vmem:[#allocation2 + $0x8] sm:$0xff] %vm225_vm1, %v838_v53  ;;  %v837_v7 = vmul.f32 0.33333334, %v829_v54 }
 0x59a   :  { %v824_v37 = vmul.f32 %v1510_v55, %v2035_v43  ;;  %v455_v43 = vadd.f32 %v1922_v30, %v1728_v2  ;;  %v457_v2 = vadd.f32 %v1914_v24, %v1716_v0 }
 0x59b   :  { %845 = vst.msk [vmem:[#allocation2] sm:$0xff] %vm225_vm1, %v837_v7 }
 0x59c   :  { %v832_v8 = vadd.f32 %v824_v37, %v453_v36 }
 0x59d   :  { %v1512_v31 = vpop.eup %1511 }
 0x59e   :  { %v840_v56 = vmul.f32 0.33333334, %v832_v8  ;;  %v823_v57 = vmul.f32 %v1512_v31, %v2037_v47  ;;  %v456_v47 = vadd.f32 %v1917_v27, %v1721_v1 }
 0x59f   :  { %v1514_v59 = vpop.eup %1513 }
 0x5a0   :  { %848 = vst.msk [vmem:[#allocation2 + $0x18] sm:$0xff] %vm225_vm1, %v840_v56  ;;  %v831_v61 = vadd.f32 %v823_v57, %v452_v9  ;;  %v825_v5 = vmul.f32 %v1514_v59, %v2046_v58 }
 0x5a1   :  { %v1516_v35 = vpop.eup %1515 }
 0x5a2   :  { %v839_v63 = vmul.f32 0.33333334, %v831_v61  ;;  %v833_v3 = vadd.f32 %v825_v5, %v454_v60  ;;  %v826_v6 = vmul.f32 %v1516_v35, %v2041_v52 }
 0x5a3   :  { %v1518_v26 = vpop.eup %1517 }
 0x5a4   :  { %847 = vst.msk [vmem:[#allocation2 + $0x10] sm:$0xff] %vm225_vm1, %v839_v63  ;;  %v841_v4 = vmul.f32 0.33333334, %v833_v3  ;;  %v834_v34 = vadd.f32 %v826_v6, %v455_v43  ;;  %v827_v58 = vmul.f32 %v1518_v26, %v2055_v17 }
 0x5a5   :  { %v1520_v16 = vpop.eup %1519 }
 0x5a6   :  { %849 = vst.msk [vmem:[#allocation2 + $0x20] sm:$0xff] %vm225_vm1, %v841_v4  ;;  %v842_v30 = vmul.f32 0.33333334, %v834_v34  ;;  %v835_v52 = vadd.f32 %v827_v58, %v456_v47  ;;  %v828_v1 = vmul.f32 %v1520_v16, %v2050_v62 }
 0x5a8   :  { %850 = vst.msk [vmem:[#allocation2 + $0x28] sm:$0xff] %vm225_vm1, %v842_v30  ;;  %v843_v27 = vmul.f32 0.33333334, %v835_v52  ;;  %v836_v17 = vadd.f32 %v828_v1, %v457_v2 }
 0x5aa   :  { %851 = vst.msk [vmem:[#allocation2 + $0x30] sm:$0xff] %vm225_vm1, %v843_v27  ;;  %v844_v0 = vmul.f32 0.33333334, %v836_v17 }
 0x5ac   :  { %852 = vst.msk [vmem:[#allocation2 + $0x38] sm:$0xff] %vm225_vm1, %v844_v0 }
 0x5b3   :  { %v857_v24 = vld [vmem:[%s856_s28] sm:$0x1]  ;;  %v1271_v62 = vld [vmem:[%s1176_s29 + $0x18] sm:$0x1]  ;;  %s1058_s28 = scalar_lea.vmem [#allocation2], %s2119_s25  ;;  %s1213_s29 = scalar_lea.vmem [#allocation2], %s2121_s26 }
 0x5b4   :  { %v1269_v18 = vld [vmem:[%s1171_s30 + $0x18] sm:$0x1]  ;;  %v883_v19 = vmul.f32 %v1271_v62, %v857_v24  ;;  %v925_v21 = vld [vmem:[%s924_s10] sm:$0x1]  ;;  %s1208_s30 = scalar_lea.vmem [#allocation2], %s2123_s27  ;;  %s1182_s10 = scalar_lea.vmem %s2251_s4, %s2105_s20 }
 0x5b5   :  { %v860_v20 = vmul.f32 %v1269_v18, %v857_v24  ;;  %v1278_v22 = vld [vmem:[%s1185_s11 + $0x18] sm:$0x1]  ;;  %v992_v14 = vld [vmem:[%s991_s16] sm:$0x1]  ;;  %s1174_s16 = scalar_lea.vmem %s2251_s4, %s2094_s1  ;;  %s1178_s1 = scalar_lea.vmem %s2251_s4, %s2092_s0 }
 0x5b6   :  { %v1274_v23 = vld [vmem:[%s1180_s12 + $0x18] sm:$0x1]  ;;  %v884_v25 = vsel %vm861_vm2, %v883_v19, 0.0  ;;  %v928_v33 = vmul.f32 %v1278_v22, %v925_v21  ;;  %v1059_v45 = vld [vmem:[%s1058_s28] sm:$0x1]  ;;  %s865_s12 = scalar_lea.vmem %s2251_s4, %s2086_s6  ;;  %s932_s0 = scalar_lea.vmem %s2251_s4, %s2100_s18 }
 0x5b7   :  { %v862_v29 = vsel %vm861_vm2, %v860_v20, 0.0  ;;  %v902_v28 = vmul.f32 %v1274_v23, %v857_v24  ;;  %885 = vadd.xlane.f32.xlu0 %v884_v25  ;;  %v1284_v32 = vld [vmem:[%s1194_s3 + $0x18] sm:$0x1]  ;;  %v866_v7 = vld [vmem:[%s865_s12] sm:$0x1]  ;;  %s1188_s20 = scalar_lea.vmem %s2251_s4, %s2102_s19  ;;  %s1192_s18 = scalar_lea.vmem %s2251_s4, %s2110_s22 }
 0x5b8   :  { %863 = vadd.xlane.f32.xlu1 %v862_v29  ;;  %v1281_v38 = vld [vmem:[%s1190_s14 + $0x18] sm:$0x1]  ;;  %v929_v10 = vsel %vm861_vm2, %v928_v33, 0.0  ;;  %v969_v12 = vmul.f32 %v1284_v32, %v925_v21  ;;  %v869_v56 = vmul.f32 %v866_v7, %v866_v7  ;;  %v933_v6 = vld [vmem:[%s932_s0] sm:$0x1]  ;;  %s1196_s19 = scalar_lea.vmem %s2251_s4, %s2107_s21  ;;  %s999_s22 = scalar_lea.vmem %s2251_s4, %s2113_s23 }
 0x5b9   :  { %v903_v11 = vsel %vm861_vm2, %v902_v28, 0.0  ;;  %v950_v13 = vmul.f32 %v1281_v38, %v925_v21  ;;  %v1291_v15 = vld [vmem:[%s1204_s5 + $0x18] sm:$0x1]  ;;  %s1222_s5 = scalar_lea.vmem [#allocation2], %s2133_s13  ;;  %v936_v34 = vmul.f32 %v933_v6, %v933_v6  ;;  %s1202_s21 = scalar_lea.vmem %s2251_s4, %s2117_s24  ;;  %v1000_v17 = vld [vmem:[%s999_s22] sm:$0x1] }
 0x5ba   :  { %v1288_v39 = vld [vmem:[%s1199_s17 + $0x18] sm:$0x1]  ;;  %v970_v40 = vsel %vm861_vm2, %v969_v12, 0.0  ;;  %v1017_v42 = vmul.f32 %v1291_v15, %v992_v14  ;;  %s1218_s17 = scalar_lea.vmem [#allocation2], %s2137_s15  ;;  %v870_v35 = vsel %vm861_vm2, %v869_v56, 0.0  ;;  %s1206_s23 = scalar_lea.vmem %s2251_s4, %s2115_s2  ;;  %v1003_v18 = vmul.f32 %v1000_v17, %v1000_v17 }
 0x5bb   :  { %930 = vadd.xlane.f32.xlu0 %v929_v10  ;;  %v951_v41 = vsel %vm861_vm2, %v950_v13, 0.0  ;;  %v995_v44 = vmul.f32 %v1288_v39, %v992_v14  ;;  %v1298_v46 = vld [vmem:[%s1213_s29 + $0x18] sm:$0x1]  ;;  %v937_v30 = vsel %vm861_vm2, %v936_v34, 0.0  ;;  %s1210_s24 = scalar_lea.vmem %s2251_s4, %s2123_s27  ;;  %s1066_s2 = scalar_lea.vmem %s2251_s4, %s2119_s25 }
 0x5bc   :  { %904 = vadd.xlane.f32.xlu1 %v903_v11  ;;  %v1294_v48 = vld [vmem:[%s1208_s30 + $0x18] sm:$0x1]  ;;  %v1018_v49 = vsel %vm861_vm2, %v1017_v42, 0.0  ;;  %v1062_v51 = vmul.f32 %v1298_v46, %v1059_v45  ;;  %s1216_s27 = scalar_lea.vmem %s2251_s4, %s2121_s26  ;;  %v1004_v22 = vsel %vm861_vm2, %v1003_v18, 0.0  ;;  %v1067_v33 = vld [vmem:[%s1066_s2] sm:$0x1] }
 0x5bd   :  { %v996_v50 = vsel %vm861_vm2, %v995_v44, 0.0  ;;  %v1036_v53 = vmul.f32 %v1294_v48, %v992_v14  ;;  %v1304_v54 = vld [vmem:[%s1222_s5 + $0x18] sm:$0x1]  ;;  %v1070_v10 = vmul.f32 %v1067_v33, %v1067_v33  ;;  %s1653_s28 = smov [#allocation7]  }
 0x5be   :  { %v1301_v55 = vld [vmem:[%s1218_s17 + $0x18] sm:$0x1]  ;;  %v1063_v37 = vsel %vm861_vm2, %v1062_v51, 0.0  ;;  %v1103_v31 = vmul.f32 %v1304_v54, %v1059_v45  ;;  %s1220_s17 = scalar_lea.vmem %s2251_s4, %s2137_s15 }
 0x5bf   :  { %971 = vadd.xlane.f32.xlu0 %v970_v40  ;;  %v1270_v36 = vld [vmem:[%s1174_s16 + $0x18] sm:$0x1]  ;;  %v1037_v8 = vsel %vm861_vm2, %v1036_v53, 0.0  ;;  %v1084_v9 = vmul.f32 %v1301_v55, %v1059_v45  ;;  %v1071_v14 = vsel %vm861_vm2, %v1070_v10, 0.0 }
 0x5c0   :  { %952 = vadd.xlane.f32.xlu1 %v951_v41  ;;  %v874_v57 = vmul.f32 %v1270_v36, %v1270_v36  ;;  %v1272_v59 = vld [vmem:[%s1178_s1 + $0x18] sm:$0x1]  ;;  %v1104_v61 = vsel %vm861_vm2, %v1103_v31, 0.0  ;;  %s1135_s1 = sshll.u32 %s1653_s28, 4  ;;  %s1136_s1 = int_to_ptr.vmem [resolvable:$true] %s1135_s1 }
 0x5c1   :  { %v1275_v60 = vld [vmem:[%s1182_s10 + $0x18] sm:$0x1]  ;;  %v1085_v5 = vsel %vm861_vm2, %v1084_v9, 0.0  ;;  %v893_v63 = vmul.f32 %v1272_v59, %v1272_v59 }
 0x5c2   :  { %v875_v43 = vsel %vm861_vm2, %v874_v57, 0.0  ;;  %v912_v3 = vmul.f32 %v1275_v60, %v1275_v60  ;;  %v1279_v26 = vld [vmem:[%s1188_s20 + $0x18] sm:$0x1] }
 0x5c3   :  { %1019 = vadd.xlane.f32.xlu0 %v1018_v49  ;;  %v894_v47 = vsel %vm861_vm2, %v893_v63, 0.0  ;;  %v941_v58 = vmul.f32 %v1279_v26, %v1279_v26  ;;  %v1282_v16 = vld [vmem:[%s1192_s18 + $0x18] sm:$0x1] }
 0x5c4   :  { %997 = vadd.xlane.f32.xlu1 %v996_v50  ;;  %v913_v4 = vsel %vm861_vm2, %v912_v3, 0.0  ;;  %v1285_v2 = vld [vmem:[%s1196_s19 + $0x18] sm:$0x1]  ;;  %v960_v1 = vmul.f32 %v1282_v16, %v1282_v16  ;;  %s1224_s19 = scalar_lea.vmem %s2251_s4, %s2133_s13  ;;  %s1651_s4 = smov [#allocation9]  }
 0x5c5   :  { %v942_v52 = vsel %vm861_vm2, %v941_v58, 0.0  ;;  %v979_v27 = vmul.f32 %v1285_v2, %v1285_v2  ;;  %v1289_v0 = vld [vmem:[%s1202_s21 + $0x18] sm:$0x1]  ;;  %s1145_s26 = sshll.u32 %s1651_s4, 4  ;;  %s1652_s13 = smov [#allocation11]   ;;  %s1146_s26 = int_to_ptr.vmem [resolvable:$true] %s1145_s26 }
 0x5c6   :  { %v961_v24 = vsel %vm861_vm2, %v960_v1, 0.0  ;;  %v1008_v19 = vmul.f32 %v1289_v0, %v1289_v0  ;;  %v1292_v20 = vld [vmem:[%s1206_s23 + $0x18] sm:$0x1]  ;;  %s1155_s15 = sshll.u32 %s1652_s13, 4  ;;  %s1581_s22 = scalar_lea.vmem %s1146_s26, 16  ;;  %s1156_s15 = int_to_ptr.vmem [resolvable:$true] %s1155_s15 }
 0x5c7   :  { %1064 = vadd.xlane.f32.xlu0 %v1063_v37  ;;  %v980_v62 = vsel %vm861_vm2, %v979_v27, 0.0  ;;  %v1295_v21 = vld [vmem:[%s1210_s24 + $0x18] sm:$0x1]  ;;  %v1027_v25 = vmul.f32 %v1292_v20, %v1292_v20  ;;  %p1582_p1 = scmp.ne.s32.totalorder %s1146_s26, %s1581_s22  ;;  %s1585_s29 = scalar_lea.vmem %s1146_s26, 32 }
 0x5c8   :  { %1038 = vadd.xlane.f32.xlu1 %v1037_v8  ;;  %v1009_v23 = vsel %vm861_vm2, %v1008_v19, 0.0  ;;  %v1046_v29 = vmul.f32 %v1295_v21, %v1295_v21  ;;  %v1299_v28 = vld [vmem:[%s1216_s27 + $0x18] sm:$0x1]  ;;  %p1586_p2 = scmp.lt.s32.totalorder %s1146_s26, %s1146_s26  ;;  %p1587_p3 = scmp.lt.s32.totalorder %s1585_s29, %s1581_s22 }
 0x5c9   :  { %v1028_v32 = vsel %vm861_vm2, %v1027_v25, 0.0  ;;  %v1075_v11 = vmul.f32 %v1299_v28, %v1299_v28  ;;  %v1302_v12 = vld [vmem:[%s1220_s17 + $0x18] sm:$0x1] }
 0x5ca   :  { %v1047_v38 = vsel %vm861_vm2, %v1046_v29, 0.0  ;;  %v1305_v13 = vld [vmem:[%s1224_s19 + $0x18] sm:$0x1]  ;;  %v1094_v39 = vmul.f32 %v1302_v12, %v1302_v12  ;;  %p1588_p4 = por %p1587_p3, %p1586_p2 }
 0x5cb   :  { %1105 = vadd.xlane.f32.xlu0 %v1104_v61  ;;  %v1076_v15 = vsel %vm861_vm2, %v1075_v11, 0.0  ;;  %v1113_v40 = vmul.f32 %v1305_v13, %v1305_v13 }
 0x5cc   :  { %1086 = vadd.xlane.f32.xlu1 %v1085_v5  ;;  %v1095_v41 = vsel %vm861_vm2, %v1094_v39, 0.0  ;;  %p1589_p5 = pnand %p1588_p4, %p1582_p1 }
 0x5cd   :  { %v1114_v42 = vsel %vm861_vm2, %v1113_v40, 0.0 }
 0x5cf   :  { %876 = vadd.xlane.f32.xlu0 %v875_v43 }
 0x5d0   :  { %871 = vadd.xlane.f32.xlu1 %v870_v35 }
 0x5d3   :  { %914 = vadd.xlane.f32.xlu0 %v913_v4 }
 0x5d4   :  { %895 = vadd.xlane.f32.xlu1 %v894_v47 }
 0x5d7   :  { %943 = vadd.xlane.f32.xlu0 %v942_v52 }
 0x5d8   :  { %938 = vadd.xlane.f32.xlu1 %v937_v30 }
 0x5db   :  { %981 = vadd.xlane.f32.xlu0 %v980_v62 }
 0x5dc   :  { %962 = vadd.xlane.f32.xlu1 %v961_v24 }
 0x5df   :  { %1010 = vadd.xlane.f32.xlu0 %v1009_v23 }
 0x5e0   :  { %1005 = vadd.xlane.f32.xlu1 %v1004_v22 }
 0x5e3   :  { %1048 = vadd.xlane.f32.xlu0 %v1047_v38 }
 0x5e4   :  { %1029 = vadd.xlane.f32.xlu1 %v1028_v32 }
 0x5e7   :  { %1077 = vadd.xlane.f32.xlu0 %v1076_v15 }
 0x5e8   :  { %1072 = vadd.xlane.f32.xlu1 %v1071_v14 }
 0x5eb   :  { %1115 = vadd.xlane.f32.xlu0 %v1114_v42 }
 0x5ec   :  { %1096 = vadd.xlane.f32.xlu1 %v1095_v41 }
 0x640   :  { %v886_v44 = vpop.xlane.xlu0 %885 }
 0x641   :  { %v864_v45 = vpop.xlane.xlu1 %863 }
 0x642   :  { %v887_v50 = vsub.f32 %v886_v44, %v864_v45 }
 0x644   :  { %v931_v46 = vpop.xlane.xlu0 %930  ;;  %v888_v8 = vmul.f32 1.442695, %v887_v50 }
 0x645   :  { %v905_v48 = vpop.xlane.xlu1 %904 }
 0x646   :  { %v906_v49 = vsub.f32 %v905_v48, %v864_v45 }
 0x648   :  { %v907_v51 = vmul.f32 1.442695, %v906_v49  ;;  %v972_v53 = vpop.xlane.xlu0 %971 }
 0x649   :  { %v953_v54 = vpop.xlane.xlu1 %952  ;;  %v973_v55 = vsub.f32 %v972_v53, %v931_v46 }
 0x64a   :  { %v954_v7 = vsub.f32 %v953_v54, %v931_v46  ;;  %1521 = vpow2.f32 %v907_v51 }
 0x64b   :  { %v974_v36 = vmul.f32 1.442695, %v973_v55 }
 0x64c   :  { %v955_v37 = vmul.f32 1.442695, %v954_v7  ;;  %v1020_v31 = vpop.xlane.xlu0 %1019 }
 0x64d   :  { %v998_v9 = vpop.xlane.xlu1 %997  ;;  %1523 = vpow2.f32 %v974_v36 }
 0x64e   :  { %v1021_v56 = vsub.f32 %v1020_v31, %v998_v9  ;;  %1525 = vpow2.f32 %v955_v37 }
 0x64f   :  { %1527 = vpow2.f32 %v888_v8 }
 0x650   :  { %v1022_v57 = vmul.f32 1.442695, %v1021_v56  ;;  %v1065_v59 = vpop.xlane.xlu0 %1064 }
 0x651   :  { %v1039_v60 = vpop.xlane.xlu1 %1038 }
 0x652   :  { %v1040_v61 = vsub.f32 %v1039_v60, %v998_v9  ;;  %1529 = vpow2.f32 %v1022_v57 }
 0x654   :  { %v1041_v5 = vmul.f32 1.442695, %v1040_v61  ;;  %v1106_v35 = vpop.xlane.xlu0 %1105 }
 0x655   :  { %v1087_v43 = vpop.xlane.xlu1 %1086  ;;  %v1107_v63 = vsub.f32 %v1106_v35, %v1065_v59 }
 0x656   :  { %1531 = vpow2.f32 %v1041_v5  ;;  %v1088_v3 = vsub.f32 %v1087_v43, %v1065_v59 }
 0x657   :  { %v1108_v6 = vmul.f32 1.442695, %v1107_v63  ;;  %v1522_v34 = vpop.eup %1521 }
 0x658   :  { %v1089_v26 = vmul.f32 1.442695, %v1088_v3  ;;  %v877_v4 = vpop.xlane.xlu0 %876 }
 0x659   :  { %v872_v47 = vpop.xlane.xlu1 %871  ;;  %1533 = vpow2.f32 %v1108_v6 }
 0x65a   :  { %v878_v58 = vadd.f32 %v877_v4, %v872_v47  ;;  %v1524_v16 = vpop.eup %1523  ;;  %1535 = vpow2.f32 %v1089_v26 }
 0x65b   :  { %v1526_v2 = vpop.eup %1525 }
 0x65c   :  { %v915_v52 = vpop.xlane.xlu0 %914  ;;  %v976_v1 = vadd.f32 %v1526_v2, %v1524_v16  ;;  %v1528_v27 = vpop.eup %1527 }
 0x65d   :  { %v896_v30 = vpop.xlane.xlu1 %895  ;;  %v909_v0 = vadd.f32 %v1528_v27, %v1522_v34 }
 0x65e   :  { %v897_v17 = vadd.f32 %v896_v30, %v878_v58  ;;  %v984_v19 = vadd.f32 1.0, %v976_v1 }
 0x65f   :  { %v1530_v20 = vpop.eup %1529  ;;  %v917_v23 = vadd.f32 1.0, %v909_v0 }
 0x660   :  { %v916_v24 = vadd.f32 %v915_v52, %v897_v17  ;;  %v944_v18 = vpop.xlane.xlu0 %943  ;;  %1537 = vlog2.f32 %v984_v19 }
 0x661   :  { %v939_v62 = vpop.xlane.xlu1 %938  ;;  %1539 = vlog2.f32 %v917_v23 }
 0x662   :  { %v940_v21 = vadd.f32 %v939_v62, %v916_v24 }
 0x663   :  { %v1532_v22 = vpop.eup %1531 }
 0x664   :  { %v945_v25 = vadd.f32 %v944_v18, %v940_v21  ;;  %v1043_v29 = vadd.f32 %v1532_v22, %v1530_v20  ;;  %v982_v28 = vpop.xlane.xlu0 %981 }
 0x665   :  { %v963_v33 = vpop.xlane.xlu1 %962 }
 0x666   :  { %v964_v32 = vadd.f32 %v963_v33, %v945_v25  ;;  %v1051_v38 = vadd.f32 1.0, %v1043_v29  ;;  %v1534_v10 = vpop.eup %1533 }
 0x667   :  { %v1536_v11 = vpop.eup %1535 }
 0x668   :  { %v983_v12 = vadd.f32 %v982_v28, %v964_v32  ;;  %1541 = vlog2.f32 %v1051_v38  ;;  %v1011_v14 = vpop.xlane.xlu0 %1010  ;;  %v1110_v15 = vadd.f32 %v1536_v11, %v1534_v10 }
 0x669   :  { %v1006_v13 = vpop.xlane.xlu1 %1005 }
 0x66a   :  { %v1007_v39 = vadd.f32 %v1006_v13, %v983_v12  ;;  %v1118_v40 = vadd.f32 1.0, %v1110_v15 }
 0x66c   :  { %v1012_v41 = vadd.f32 %v1011_v14, %v1007_v39  ;;  %v1049_v44 = vpop.xlane.xlu0 %1048  ;;  %1543 = vlog2.f32 %v1118_v40 }
 0x66d   :  { %v1030_v42 = vpop.xlane.xlu1 %1029  ;;  %v1538_v50 = vpop.eup %1537 }
 0x66e   :  { %v1031_v45 = vadd.f32 %v1030_v42, %v1012_v41  ;;  %v1540_v53 = vpop.eup %1539  ;;  %v986_v37 = vmul.f32 0.6931472, %v1538_v50 }
 0x66f   :  { %v919_v31 = vmul.f32 0.6931472, %v1540_v53 }
 0x670   :  { %v1050_v46 = vadd.f32 %v1049_v44, %v1031_v45  ;;  %v1078_v49 = vpop.xlane.xlu0 %1077 }
 0x671   :  { %v1073_v48 = vpop.xlane.xlu1 %1072  ;;  %v987_v57 = vadd.f32 %v986_v37, %v919_v31 }
 0x672   :  { %v1074_v51 = vadd.f32 %v1073_v48, %v1050_v46 }
 0x674   :  { %v1079_v54 = vadd.f32 %v1078_v49, %v1074_v51  ;;  %v1116_v36 = vpop.xlane.xlu0 %1115 }
 0x675   :  { %v1542_v55 = vpop.eup %1541  ;;  %v1097_v7 = vpop.xlane.xlu1 %1096 }
 0x676   :  { %v1098_v8 = vadd.f32 %v1097_v7, %v1079_v54  ;;  %v1053_v9 = vmul.f32 0.6931472, %v1542_v55 }
 0x678   :  { %v1117_v56 = vadd.f32 %v1116_v36, %v1098_v8  ;;  %v1054_v61 = vadd.f32 %v1053_v9, %v987_v57 }
 0x679   :  { %v1544_v59 = vpop.eup %1543 }
 0x67a   :  { %v1123_v60 = vmul.f32 1.25e-05, %v1117_v56  ;;  %v1120_v5 = vmul.f32 0.6931472, %v1544_v59 }
 0x67c   :  { %1126 = vst.msk [vmem:[#allocation11] sm:$0x1] %vm1124_vm3, %v1123_v60  ;;  %v1121_v35 = vadd.f32 %v1120_v5, %v1054_v61 }
 0x67e   :  { %v1122_v43 = vmul.f32 0.25, %v1121_v35 }
 0x680   :  { %1125 = vst.msk [vmem:[#allocation9] sm:$0x1] %vm1124_vm3, %v1122_v43  ;;  %v1127_v63 = vadd.f32 %v1123_v60, %v1122_v43 }
 0x681   :  { %1592 = shalt.err (!%p1589_p5)
}
 0x682   :  { %1148 = dma.vmem_to_hbm [thread:$0]  %s1146_s26, 16, %s2255_s8, [#allocation10]   ;;  %1128 = vst.msk [vmem:[#allocation7] sm:$0x1] %vm1124_vm3, %v1127_v63 }
 0x683   :  { %s1601_s10 = scalar_lea.vmem %s1156_s15, 16  ;;  %s1605_s11 = scalar_lea.vmem %s1156_s15, 32 }
 0x684   :  { %p1602_p6 = scmp.ne.s32.totalorder %s1156_s15, %s1601_s10  ;;  %p1606_p7 = scmp.lt.s32.totalorder %s1156_s15, %s1156_s15 }
 0x685   :  { %p1607_p8 = scmp.lt.s32.totalorder %s1605_s11, %s1601_s10 }
 0x687   :  { %p1608_p9 = por %p1607_p8, %p1606_p7 }
 0x689   :  { %p1609_p10 = pnand %p1608_p9, %p1602_p6 }
 0x68b   :  { %1612 = shalt.err (!%p1609_p10)
}
 0x68c   :  { %1158 = dma.vmem_to_hbm [thread:$0]  %s1156_s15, 16, %s2256_s9, [#allocation10]  }
 0x68d   :  { %s1621_s0 = scalar_lea.vmem %s1136_s1, 16  ;;  %s1625_s24 = scalar_lea.vmem %s1136_s1, 32 }
 0x68e   :  { %p1622_p11 = scmp.ne.s32.totalorder %s1136_s1, %s1621_s0  ;;  %p1626_p12 = scmp.lt.s32.totalorder %s1136_s1, %s1136_s1 }
 0x68f   :  { %p1627_p13 = scmp.lt.s32.totalorder %s1625_s24, %s1621_s0 }
 0x691   :  { %p1628_p0 = por %p1627_p13, %p1626_p12 }
 0x693   :  { %p1629_p1 = pnand %p1628_p0, %p1622_p11 }
 0x695   :  { %1632 = shalt.err (!%p1629_p1)
}
 0x696   :  { %1138 = dma.vmem_to_hbm [thread:$0]  %s1136_s1, 16, %s2254_s7, [#allocation8]  }
 0x697   :  { %1643 = dma.done.wait [#allocation8], 16  }
 0x698   :  { %1644 = vsyncadd [#allocation8], 4294967280 }
 0x699   :  { %1645 = dma.done.wait [#allocation10], 32  }
 0x69a   :  { %1646 = vsyncadd [#allocation10], 4294967264 }
 0x69b   :  { %1168 = vsyncpa [#allocation8], 1 }
 0x69c   :  { %1169 = vsyncpa [#allocation10], 1 }

</bundles_post_ra>
